<compile_context>
chip_gen: v6e
topology: v6e:2x2x1
jax: 0.10.0
libtpu: 0.0.40
codegen_flags: <defaults>
</compile_context>

<pallas_src>
import functools
import math

import jax
import jax.numpy as jnp
from jax.experimental import pallas as pl
from jax.experimental.pallas import tpu as pltpu

# Matmul operand dtype.  jnp.bfloat16 doubles MXU throughput on v6e/v7x and
# halves weight HBM/VMEM traffic (accumulation stays f32 via
# preferred_element_type); kept at f32 here for exact parity with the PyTorch
# reference semantics.
MATMUL_DTYPE = jnp.float32
LN_EPS = 1e-5


# ---------------------------------------------------------------------------
# In-kernel helpers
# ---------------------------------------------------------------------------

def _mm(a, b):
    return jnp.dot(a.astype(MATMUL_DTYPE), b.astype(MATMUL_DTYPE),
                   preferred_element_type=jnp.float32)


def _layernorm(h, g, b):
    mean = jnp.mean(h, axis=-1, keepdims=True)
    var = jnp.mean(jnp.square(h - mean), axis=-1, keepdims=True)
    return (h - mean) * jax.lax.rsqrt(var + LN_EPS) * g + b


# ---------------------------------------------------------------------------
# Pallas kernels
# ---------------------------------------------------------------------------

def _embed_ln_kernel(x_ref, pos_ref, g_ref, b_ref, o_ref):
    """LayerNorm(item_emb + pos_emb) for one batch row-block (S, D)."""
    o_ref[...] = _layernorm(x_ref[...] + pos_ref[...], g_ref[...], b_ref[...])


def _qkv_kernel(x_ref, w_ref, b_ref, o_ref):
    """y = x @ W_in + b_in   (row-tiled; W_in stays VMEM-resident)."""
    o_ref[...] = _mm(x_ref[...], w_ref[...]) + b_ref[...]


def _attn_kernel(qkv_ref, o_ref, *, num_heads, head_dim, scale):
    """Causal multi-head attention for one batch; all heads per grid step.

    Head split is a static lane slice of the (S, 3D) qkv slab, so no JAX-side
    transposes are needed, and the output is stored as a lane-dense (S, D)
    slab (heads concatenated on the lane axis).
    """
    D = num_heads * head_dim
    qkv = qkv_ref[...]                         # (S, 3D)
    q = qkv[:, :D] * scale                     # fold 1/sqrt(Dh) into q (S*D muls)
    k = qkv[:, D:2 * D]
    v = qkv[:, 2 * D:3 * D]
    S = q.shape[0]
    row = jax.lax.broadcasted_iota(jnp.int32, (S, S), 0)
    col = jax.lax.broadcasted_iota(jnp.int32, (S, S), 1)
    causal = col > row                         # strictly-upper triangle masked

    outs = []
    for h in range(num_heads):                 # static unroll over heads
        sl = slice(h * head_dim, (h + 1) * head_dim)
        qh = q[:, sl].astype(MATMUL_DTYPE)
        kh = k[:, sl].astype(MATMUL_DTYPE)
        vh = v[:, sl]
        # contract on the last (Dh) axes -> MXU consumes K directly, no k.T
        s = jax.lax.dot_general(qh, kh, (((1,), (1,)), ((), ())),
                                preferred_element_type=jnp.float32)
        s = jnp.where(causal, -1e30, s)        # large finite mask (NaN-safe)
        m = jnp.max(s, axis=-1, keepdims=True)
        p = jnp.exp(s - m)
        p = p * pl.reciprocal(jnp.sum(p, axis=-1, keepdims=True), approx=True)
        outs.append(_mm(p, vh))
    o_ref[...] = jnp.concatenate(outs, axis=-1)     # lane-dense (S, D) store


def _proj_add_ln_kernel(a_ref, x_ref, w_ref, b_ref, g_ref, bt_ref, o_ref):
    """LayerNorm(x + attn @ W_out + b_out)   (fused epilogue, row-tiled)."""
    y = _mm(a_ref[...], w_ref[...]) + b_ref[...]
    o_ref[...] = _layernorm(x_ref[...] + y, g_ref[...], bt_ref[...])


def _ffn_add_ln_kernel(x_ref, w1_ref, b1_ref, w2_ref, b2_ref, g_ref, bt_ref,
                       o_ref):
    """LayerNorm(x + W2 @ relu(W1 @ x))   (fused FFN + residual + LN)."""
    x = x_ref[...]
    h = jnp.maximum(_mm(x, w1_ref[...]) + b1_ref[...], 0.0)
    y = _mm(h, w2_ref[...]) + b2_ref[...]
    o_ref[...] = _layernorm(x + y, g_ref[...], bt_ref[...])


# ---------------------------------------------------------------------------
# Wrappers (pallas_call plumbing)
# ---------------------------------------------------------------------------

def _row_tile(M):
    """Row-tile size: whole slab when small, otherwise 512 rows (8-aligned).

    512-row tiles sit near the HBM roofline; re-derive against 64 MiB VMEM on
    v7x if weights grow (see TODO in ffn_add_layernorm).
    """
    if M <= 512:
        return M
    return 512


def _parallel(n=1):
    return pltpu.CompilerParams(dimension_semantics=("parallel",) * n)


def embed_layernorm(x, pos, gamma, beta, B, S, D):
    return pl.pallas_call(
        _embed_ln_kernel,
        out_shape=jax.ShapeDtypeStruct((B * S, D), jnp.float32),
        grid=(B,),
        in_specs=[
            pl.BlockSpec((S, D), lambda b: (b, 0)),
            pl.BlockSpec((S, D), lambda b: (0, 0)),
            pl.BlockSpec((1, D), lambda b: (0, 0)),
            pl.BlockSpec((1, D), lambda b: (0, 0)),
        ],
        out_specs=pl.BlockSpec((S, D), lambda b: (b, 0)),
        compiler_params=_parallel(),
    )(x, pos, gamma.reshape(1, D), beta.reshape(1, D))


def qkv_proj(x, w, b):
    M, K = x.shape
    N = w.shape[1]
    TM = _row_tile(M)
    return pl.pallas_call(
        _qkv_kernel,
        out_shape=jax.ShapeDtypeStruct((M, N), jnp.float32),
        grid=(pl.cdiv(M, TM),),
        in_specs=[
            pl.BlockSpec((TM, K), lambda i: (i, 0)),
            pl.BlockSpec((K, N), lambda i: (0, 0)),   # weight VMEM-resident
            pl.BlockSpec((1, N), lambda i: (0, 0)),
        ],
        out_specs=pl.BlockSpec((TM, N), lambda i: (i, 0)),
        compiler_params=_parallel(),
        cost_estimate=pl.CostEstimate(
            flops=2 * M * K * N, transcendentals=0,
            bytes_accessed=4 * (M * K + K * N + M * N)),
    )(x, w, b.reshape(1, N))


def causal_attention(qkv, B, S, D, H):
    Dh = D // H
    scale = 1.0 / math.sqrt(Dh)
    return pl.pallas_call(
        functools.partial(_attn_kernel, num_heads=H, head_dim=Dh, scale=scale),
        out_shape=jax.ShapeDtypeStruct((B * S, D), jnp.float32),
        grid=(B,),
        in_specs=[pl.BlockSpec((S, 3 * D), lambda b: (b, 0))],
        out_specs=pl.BlockSpec((S, D), lambda b: (b, 0)),
        compiler_params=_parallel(),
    )(qkv)


def proj_add_layernorm(attn, x, w, b, gamma, beta):
    M, D = x.shape
    TM = _row_tile(M)
    return pl.pallas_call(
        _proj_add_ln_kernel,
        out_shape=jax.ShapeDtypeStruct((M, D), jnp.float32),
        grid=(pl.cdiv(M, TM),),
        in_specs=[
            pl.BlockSpec((TM, D), lambda i: (i, 0)),
            pl.BlockSpec((TM, D), lambda i: (i, 0)),
            pl.BlockSpec((D, D), lambda i: (0, 0)),
            pl.BlockSpec((1, D), lambda i: (0, 0)),
            pl.BlockSpec((1, D), lambda i: (0, 0)),
            pl.BlockSpec((1, D), lambda i: (0, 0)),
        ],
        out_specs=pl.BlockSpec((TM, D), lambda i: (i, 0)),
        compiler_params=_parallel(),
        cost_estimate=pl.CostEstimate(
            flops=2 * M * D * D, transcendentals=0,
            bytes_accessed=4 * (3 * M * D + D * D)),
    )(attn, x, w, b.reshape(1, D), gamma.reshape(1, D), beta.reshape(1, D))


def ffn_add_layernorm(x, w1, b1, w2, b2, gamma, beta):
    M, D = x.shape
    F = w1.shape[1]
    TM = _row_tile(M)
    # TODO(synk): at realistic D (2048) the f32 W1/W2 pair (~96 MiB) exceeds
    # v7x's 64 MiB VMEM; there, tile the FFN hidden dim (F) with an
    # "arbitrary" reduction axis (or store weights in bf16) and set
    # pltpu.CompilerParams(vmem_limit_bytes=...) accordingly.
    return pl.pallas_call(
        _ffn_add_ln_kernel,
        out_shape=jax.ShapeDtypeStruct((M, D), jnp.float32),
        grid=(pl.cdiv(M, TM),),
        in_specs=[
            pl.BlockSpec((TM, D), lambda i: (i, 0)),
            pl.BlockSpec((D, F), lambda i: (0, 0)),
            pl.BlockSpec((1, F), lambda i: (0, 0)),
            pl.BlockSpec((F, D), lambda i: (0, 0)),
            pl.BlockSpec((1, D), lambda i: (0, 0)),
            pl.BlockSpec((1, D), lambda i: (0, 0)),
            pl.BlockSpec((1, D), lambda i: (0, 0)),
        ],
        out_specs=pl.BlockSpec((TM, D), lambda i: (i, 0)),
        compiler_params=_parallel(),
        cost_estimate=pl.CostEstimate(
            flops=4 * M * D * F, transcendentals=0,
            bytes_accessed=4 * (2 * M * D + 2 * D * F)),
    )(x, w1, b1.reshape(1, F), w2, b2.reshape(1, D),
      gamma.reshape(1, D), beta.reshape(1, D))


# ---------------------------------------------------------------------------
# SASRec model (forward only)
# ---------------------------------------------------------------------------

def init_params(key, num_items, hidden_dim, max_len, num_blocks, ffn_dim):
    keys = jax.random.split(key, 3 + num_blocks)
    std = 0.02

    item_emb = std * jax.random.normal(keys[0], (num_items + 1, hidden_dim),
                                       jnp.float32)
    item_emb = item_emb.at[0].set(0.0)                      # padding_idx=0
    pos_emb = std * jax.random.normal(keys[1], (max_len, hidden_dim),
                                      jnp.float32)

    def init_block(k):
        ks = jax.random.split(k, 4)
        return dict(
            in_proj_w=std * jax.random.normal(ks[0], (hidden_dim, 3 * hidden_dim), jnp.float32),
            in_proj_b=jnp.zeros((3 * hidden_dim,), jnp.float32),
            out_proj_w=std * jax.random.normal(ks[1], (hidden_dim, hidden_dim), jnp.float32),
            out_proj_b=jnp.zeros((hidden_dim,), jnp.float32),
            ff1_w=std * jax.random.normal(ks[2], (hidden_dim, ffn_dim), jnp.float32),
            ff1_b=jnp.zeros((ffn_dim,), jnp.float32),
            ff2_w=std * jax.random.normal(ks[3], (ffn_dim, hidden_dim), jnp.float32),
            ff2_b=jnp.zeros((hidden_dim,), jnp.float32),
            ln1_g=jnp.ones((hidden_dim,), jnp.float32),
            ln1_b=jnp.zeros((hidden_dim,), jnp.float32),
            ln2_g=jnp.ones((hidden_dim,), jnp.float32),
            ln2_b=jnp.zeros((hidden_dim,), jnp.float32),
        )

    return dict(
        item_emb=item_emb,
        pos_emb=pos_emb,
        ln_g=jnp.ones((hidden_dim,), jnp.float32),
        ln_b=jnp.zeros((hidden_dim,), jnp.float32),
        blocks=[init_block(keys[3 + i]) for i in range(num_blocks)],
    )


def encoder_layer(x, p, B, S, D, H):
    """nn.TransformerEncoderLayer (post-norm, ReLU FFN, eval mode) in 4 calls."""
    qkv = qkv_proj(x, p["in_proj_w"], p["in_proj_b"])        # (B*S, 3D)
    attn = causal_attention(qkv, B, S, D, H)                 # (B*S, D) lane-dense
    x = proj_add_layernorm(attn, x, p["out_proj_w"], p["out_proj_b"],
                           p["ln1_g"], p["ln1_b"])           # out_proj + res + LN1
    x = ffn_add_layernorm(x, p["ff1_w"], p["ff1_b"], p["ff2_w"], p["ff2_b"],
                          p["ln2_g"], p["ln2_b"])            # FFN + res + LN2
    return x


def sasrec_forward(params, input_seq, *, hidden_dim, num_heads):
    B, S = input_seq.shape
    D = hidden_dim

    item_emb = jnp.take(params["item_emb"], input_seq, axis=0).reshape(B * S, D)
    pos_emb = params["pos_emb"][:S]                           # (S, D)

    # TODO(synk): dropout is identity here (eval-mode forward semantics).
    x = embed_layernorm(item_emb, pos_emb, params["ln_g"], params["ln_b"],
                        B, S, D)

    for p in params["blocks"]:
        x = encoder_layer(x, p, B, S, D, num_heads)

    return x.reshape(B, S, D)


# ---------------------------------------------------------------------------
# Main
# ---------------------------------------------------------------------------

if __name__ == "__main__":
    NUM_ITEMS = 20
    HIDDEN = 32
    MAX_LEN = 8
    HEADS = 2
    BLOCKS = 2
    FFN = HIDDEN * 4
    B, S = 2, 8

    key = jax.random.PRNGKey(0)
    pkey, dkey = jax.random.split(key)
    params = init_params(pkey, NUM_ITEMS, HIDDEN, MAX_LEN, BLOCKS, FFN)

    input_seq = jax.random.randint(dkey, (B, S), minval=0, maxval=NUM_ITEMS + 1,
                                   dtype=jnp.int32)

    fwd = jax.jit(functools.partial(sasrec_forward, hidden_dim=HIDDEN,
                                    num_heads=HEADS))
    out = fwd(params, input_seq)
    jax.block_until_ready(out)
    assert out.shape == (B, S, HIDDEN)
    assert bool(jnp.all(jnp.isfinite(out)))
    print("KERNEL_OK")
</pallas_src>

<mosaic_0001>
module attributes {stable_mosaic.version = 11 : i64} {
  func.func @_qkv_kernel(%arg0: i32, %arg1: memref<16x32xf32, #tpu.memory_space<vmem>>, %arg2: memref<32x96xf32, #tpu.memory_space<vmem>>, %arg3: memref<1x96xf32, #tpu.memory_space<vmem>>, %arg4: memref<16x96xf32, #tpu.memory_space<vmem>>) attributes {dimension_semantics = [#tpu.dimension_semantics<parallel>], iteration_bounds = array<i64: 1>, scalar_prefetch = 0 : i64, scratch_operands = 0 : i64, tpu.core_type = #tpu.core_type<tc>, window_params = [{transform_indices = @transform_0, window_bounds = array<i64: 16, 32>}, {pipeline_mode = #tpu.pipeline_mode<synchronous>, transform_indices = @transform_1, window_bounds = array<i64: 32, 96>}, {pipeline_mode = #tpu.pipeline_mode<synchronous>, transform_indices = @transform_2, window_bounds = array<i64: 1, 96>}, {transform_indices = @transform_3, window_bounds = array<i64: 16, 96>}]} {
    %c0 = arith.constant 0 : index
    %c0_0 = arith.constant 0 : index
    %0 = vector.load %arg1[%c0, %c0_0] : memref<16x32xf32, #tpu.memory_space<vmem>>, vector<16x32xf32>
    %c0_1 = arith.constant 0 : index
    %c0_2 = arith.constant 0 : index
    %1 = vector.load %arg2[%c0_1, %c0_2] : memref<32x96xf32, #tpu.memory_space<vmem>>, vector<32x96xf32>
    %cst = arith.constant dense<0.000000e+00> : vector<16x96xf32>
    %2 = tpu.matmul %0, %1, %cst {dimension_numbers = #tpu.dot_dimension_numbers<[1], [0], [0], [1], [0, 0, 1, 1], [], []>} : vector<16x32xf32>, vector<32x96xf32>, vector<16x96xf32> -> vector<16x96xf32>
    %c0_3 = arith.constant 0 : index
    %c0_4 = arith.constant 0 : index
    %3 = vector.load %arg3[%c0_3, %c0_4] : memref<1x96xf32, #tpu.memory_space<vmem>>, vector<1x96xf32>
    %4 = vector.broadcast %3 : vector<1x96xf32> to vector<16x96xf32>
    %5 = arith.addf %2, %4 : vector<16x96xf32>
    %c0_5 = arith.constant 0 : index
    %c0_6 = arith.constant 0 : index
    %6 = vector.load %arg4[%c0_5, %c0_6] : memref<16x96xf32, #tpu.memory_space<vmem>>, vector<16x96xf32>
    tpu.vector_store %arg4[%c0_5, %c0_6], %5 {strides = array<i32>} : memref<16x96xf32, #tpu.memory_space<vmem>>, vector<16x96xf32>,
    return
  }
  func.func @transform_0(%arg0: i32) -> (i32, i32) {
    %c0_i32 = arith.constant 0 : i32
    %c0_i32_0 = arith.constant 0 : i32
    return %arg0, %c0_i32 : i32, i32
  }
  func.func @transform_1(%arg0: i32) -> (i32, i32) {
    %c0_i32 = arith.constant 0 : i32
    %c0_i32_0 = arith.constant 0 : i32
    %c0_i32_1 = arith.constant 0 : i32
    return %c0_i32, %c0_i32_0 : i32, i32
  }
  func.func @transform_2(%arg0: i32) -> (i32, i32) {
    %c0_i32 = arith.constant 0 : i32
    %c0_i32_0 = arith.constant 0 : i32
    %c0_i32_1 = arith.constant 0 : i32
    return %c0_i32, %c0_i32_0 : i32, i32
  }
  func.func @transform_3(%arg0: i32) -> (i32, i32) {
    %c0_i32 = arith.constant 0 : i32
    %c0_i32_0 = arith.constant 0 : i32
    return %arg0, %c0_i32 : i32, i32
  }
}

module attributes {stable_mosaic.version = 11 : i64} {
  func.func @_embed_ln_kernel(%arg0: i32, %arg1: memref<8x32xf32, #tpu.memory_space<vmem>>, %arg2: memref<8x32xf32, #tpu.memory_space<vmem>>, %arg3: memref<1x32xf32, #tpu.memory_space<vmem>>, %arg4: memref<1x32xf32, #tpu.memory_space<vmem>>, %arg5: memref<8x32xf32, #tpu.memory_space<vmem>>) attributes {dimension_semantics = [#tpu.dimension_semantics<parallel>], iteration_bounds = array<i64: 2>, scalar_prefetch = 0 : i64, scratch_operands = 0 : i64, tpu.core_type = #tpu.core_type<tc>, window_params = [{transform_indices = @transform_0, window_bounds = array<i64: 8, 32>}, {pipeline_mode = #tpu.pipeline_mode<synchronous>, transform_indices = @transform_1, window_bounds = array<i64: 8, 32>}, {pipeline_mode = #tpu.pipeline_mode<synchronous>, transform_indices = @transform_2, window_bounds = array<i64: 1, 32>}, {pipeline_mode = #tpu.pipeline_mode<synchronous>, transform_indices = @transform_3, window_bounds = array<i64: 1, 32>}, {transform_indices = @transform_4, window_bounds = array<i64: 8, 32>}]} {
    %c0 = arith.constant 0 : index
    %c0_0 = arith.constant 0 : index
    %0 = vector.load %arg1[%c0, %c0_0] : memref<8x32xf32, #tpu.memory_space<vmem>>, vector<8x32xf32>
    %c0_1 = arith.constant 0 : index
    %c0_2 = arith.constant 0 : index
    %1 = vector.load %arg2[%c0_1, %c0_2] : memref<8x32xf32, #tpu.memory_space<vmem>>, vector<8x32xf32>
    %2 = arith.addf %0, %1 : vector<8x32xf32>
    %c0_3 = arith.constant 0 : index
    %c0_4 = arith.constant 0 : index
    %3 = vector.load %arg3[%c0_3, %c0_4] : memref<1x32xf32, #tpu.memory_space<vmem>>, vector<1x32xf32>
    %c0_5 = arith.constant 0 : index
    %c0_6 = arith.constant 0 : index
    %4 = vector.load %arg4[%c0_5, %c0_6] : memref<1x32xf32, #tpu.memory_space<vmem>>, vector<1x32xf32>
    %cst = arith.constant dense<0.000000e+00> : vector<8xf32>
    %5 = vector.multi_reduction <add>, %2, %cst [1] : vector<8x32xf32> to vector<8xf32>
    %6 = vector.shape_cast %5 : vector<8xf32> to vector<8x1xf32>
    %cst_7 = arith.constant 3.200000e+01 : f32
    %7 = vector.broadcast %cst_7 : f32 to vector<8x1xf32>
    %8 = arith.divf %6, %7 : vector<8x1xf32>
    %9 = vector.broadcast %8 : vector<8x1xf32> to vector<8x32xf32>
    %10 = arith.subf %2, %9 : vector<8x32xf32>
    %11 = arith.mulf %10, %10 : vector<8x32xf32>
    %cst_8 = arith.constant dense<0.000000e+00> : vector<8xf32>
    %12 = vector.multi_reduction <add>, %11, %cst_8 [1] : vector<8x32xf32> to vector<8xf32>
    %13 = vector.shape_cast %12 : vector<8xf32> to vector<8x1xf32>
    %cst_9 = arith.constant 3.200000e+01 : f32
    %14 = vector.broadcast %cst_9 : f32 to vector<8x1xf32>
    %15 = arith.divf %13, %14 : vector<8x1xf32>
    %16 = vector.broadcast %8 : vector<8x1xf32> to vector<8x32xf32>
    %17 = arith.subf %2, %16 : vector<8x32xf32>
    %cst_10 = arith.constant 9.99999974E-6 : f32
    %18 = vector.broadcast %cst_10 : f32 to vector<8x1xf32>
    %19 = arith.addf %15, %18 : vector<8x1xf32>
    %20 = math.rsqrt %19 : vector<8x1xf32>
    %21 = vector.broadcast %20 : vector<8x1xf32> to vector<8x32xf32>
    %22 = arith.mulf %17, %21 : vector<8x32xf32>
    %23 = vector.broadcast %3 : vector<1x32xf32> to vector<8x32xf32>
    %24 = arith.mulf %22, %23 : vector<8x32xf32>
    %25 = vector.broadcast %4 : vector<1x32xf32> to vector<8x32xf32>
    %26 = arith.addf %24, %25 : vector<8x32xf32>
    %c0_11 = arith.constant 0 : index
    %c0_12 = arith.constant 0 : index
    %27 = vector.load %arg5[%c0_11, %c0_12] : memref<8x32xf32, #tpu.memory_space<vmem>>, vector<8x32xf32>
    tpu.vector_store %arg5[%c0_11, %c0_12], %26 {strides = array<i32>} : memref<8x32xf32, #tpu.memory_space<vmem>>, vector<8x32xf32>,
    return
  }
  func.func @transform_0(%arg0: i32) -> (i32, i32) {
    %c0_i32 = arith.constant 0 : i32
    %c0_i32_0 = arith.constant 0 : i32
    return %arg0, %c0_i32 : i32, i32
  }
  func.func @transform_1(%arg0: i32) -> (i32, i32) {
    %c0_i32 = arith.constant 0 : i32
    %c0_i32_0 = arith.constant 0 : i32
    %c0_i32_1 = arith.constant 0 : i32
    return %c0_i32, %c0_i32_0 : i32, i32
  }
  func.func @transform_2(%arg0: i32) -> (i32, i32) {
    %c0_i32 = arith.constant 0 : i32
    %c0_i32_0 = arith.constant 0 : i32
    %c0_i32_1 = arith.constant 0 : i32
    return %c0_i32, %c0_i32_0 : i32, i32
  }
  func.func @transform_3(%arg0: i32) -> (i32, i32) {
    %c0_i32 = arith.constant 0 : i32
    %c0_i32_0 = arith.constant 0 : i32
    %c0_i32_1 = arith.constant 0 : i32
    return %c0_i32, %c0_i32_0 : i32, i32
  }
  func.func @transform_4(%arg0: i32) -> (i32, i32) {
    %c0_i32 = arith.constant 0 : i32
    %c0_i32_0 = arith.constant 0 : i32
    return %arg0, %c0_i32 : i32, i32
  }
}

module attributes {stable_mosaic.version = 11 : i64} {
  func.func @_proj_add_ln_kernel(%arg0: i32, %arg1: memref<16x32xf32, #tpu.memory_space<vmem>>, %arg2: memref<16x32xf32, #tpu.memory_space<vmem>>, %arg3: memref<32x32xf32, #tpu.memory_space<vmem>>, %arg4: memref<1x32xf32, #tpu.memory_space<vmem>>, %arg5: memref<1x32xf32, #tpu.memory_space<vmem>>, %arg6: memref<1x32xf32, #tpu.memory_space<vmem>>, %arg7: memref<16x32xf32, #tpu.memory_space<vmem>>) attributes {dimension_semantics = [#tpu.dimension_semantics<parallel>], iteration_bounds = array<i64: 1>, scalar_prefetch = 0 : i64, scratch_operands = 0 : i64, tpu.core_type = #tpu.core_type<tc>, window_params = [{transform_indices = @transform_0, window_bounds = array<i64: 16, 32>}, {transform_indices = @transform_1, window_bounds = array<i64: 16, 32>}, {pipeline_mode = #tpu.pipeline_mode<synchronous>, transform_indices = @transform_2, window_bounds = array<i64: 32, 32>}, {pipeline_mode = #tpu.pipeline_mode<synchronous>, transform_indices = @transform_3, window_bounds = array<i64: 1, 32>}, {pipeline_mode = #tpu.pipeline_mode<synchronous>, transform_indices = @transform_4, window_bounds = array<i64: 1, 32>}, {pipeline_mode = #tpu.pipeline_mode<synchronous>, transform_indices = @transform_5, window_bounds = array<i64: 1, 32>}, {transform_indices = @transform_6, window_bounds = array<i64: 16, 32>}]} {
    %c0 = arith.constant 0 : index
    %c0_0 = arith.constant 0 : index
    %0 = vector.load %arg1[%c0, %c0_0] : memref<16x32xf32, #tpu.memory_space<vmem>>, vector<16x32xf32>
    %c0_1 = arith.constant 0 : index
    %c0_2 = arith.constant 0 : index
    %1 = vector.load %arg3[%c0_1, %c0_2] : memref<32x32xf32, #tpu.memory_space<vmem>>, vector<32x32xf32>
    %cst = arith.constant dense<0.000000e+00> : vector<16x32xf32>
    %2 = tpu.matmul %0, %1, %cst {dimension_numbers = #tpu.dot_dimension_numbers<[1], [0], [0], [1], [0, 0, 1, 1], [], []>} : vector<16x32xf32>, vector<32x32xf32>, vector<16x32xf32> -> vector<16x32xf32>
    %c0_3 = arith.constant 0 : index
    %c0_4 = arith.constant 0 : index
    %3 = vector.load %arg4[%c0_3, %c0_4] : memref<1x32xf32, #tpu.memory_space<vmem>>, vector<1x32xf32>
    %4 = vector.broadcast %3 : vector<1x32xf32> to vector<16x32xf32>
    %5 = arith.addf %2, %4 : vector<16x32xf32>
    %c0_5 = arith.constant 0 : index
    %c0_6 = arith.constant 0 : index
    %6 = vector.load %arg2[%c0_5, %c0_6] : memref<16x32xf32, #tpu.memory_space<vmem>>, vector<16x32xf32>
    %7 = arith.addf %6, %5 : vector<16x32xf32>
    %c0_7 = arith.constant 0 : index
    %c0_8 = arith.constant 0 : index
    %8 = vector.load %arg5[%c0_7, %c0_8] : memref<1x32xf32, #tpu.memory_space<vmem>>, vector<1x32xf32>
    %c0_9 = arith.constant 0 : index
    %c0_10 = arith.constant 0 : index
    %9 = vector.load %arg6[%c0_9, %c0_10] : memref<1x32xf32, #tpu.memory_space<vmem>>, vector<1x32xf32>
    %cst_11 = arith.constant dense<0.000000e+00> : vector<16xf32>
    %10 = vector.multi_reduction <add>, %7, %cst_11 [1] : vector<16x32xf32> to vector<16xf32>
    %11 = vector.shape_cast %10 : vector<16xf32> to vector<16x1xf32>
    %cst_12 = arith.constant 3.200000e+01 : f32
    %12 = vector.broadcast %cst_12 : f32 to vector<16x1xf32>
    %13 = arith.divf %11, %12 : vector<16x1xf32>
    %14 = vector.broadcast %13 : vector<16x1xf32> to vector<16x32xf32>
    %15 = arith.subf %7, %14 : vector<16x32xf32>
    %16 = arith.mulf %15, %15 : vector<16x32xf32>
    %cst_13 = arith.constant dense<0.000000e+00> : vector<16xf32>
    %17 = vector.multi_reduction <add>, %16, %cst_13 [1] : vector<16x32xf32> to vector<16xf32>
    %18 = vector.shape_cast %17 : vector<16xf32> to vector<16x1xf32>
    %cst_14 = arith.constant 3.200000e+01 : f32
    %19 = vector.broadcast %cst_14 : f32 to vector<16x1xf32>
    %20 = arith.divf %18, %19 : vector<16x1xf32>
    %21 = vector.broadcast %13 : vector<16x1xf32> to vector<16x32xf32>
    %22 = arith.subf %7, %21 : vector<16x32xf32>
    %cst_15 = arith.constant 9.99999974E-6 : f32
    %23 = vector.broadcast %cst_15 : f32 to vector<16x1xf32>
    %24 = arith.addf %20, %23 : vector<16x1xf32>
    %25 = math.rsqrt %24 : vector<16x1xf32>
    %26 = vector.broadcast %25 : vector<16x1xf32> to vector<16x32xf32>
    %27 = arith.mulf %22, %26 : vector<16x32xf32>
    %28 = vector.broadcast %8 : vector<1x32xf32> to vector<16x32xf32>
    %29 = arith.mulf %27, %28 : vector<16x32xf32>
    %30 = vector.broadcast %9 : vector<1x32xf32> to vector<16x32xf32>
    %31 = arith.addf %29, %30 : vector<16x32xf32>
    %c0_16 = arith.constant 0 : index
    %c0_17 = arith.constant 0 : index
    %32 = vector.load %arg7[%c0_16, %c0_17] : memref<16x32xf32, #tpu.memory_space<vmem>>, vector<16x32xf32>
    tpu.vector_store %arg7[%c0_16, %c0_17], %31 {strides = array<i32>} : memref<16x32xf32, #tpu.memory_space<vmem>>, vector<16x32xf32>,
    return
  }
  func.func @transform_0(%arg0: i32) -> (i32, i32) {
    %c0_i32 = arith.constant 0 : i32
    %c0_i32_0 = arith.constant 0 : i32
    return %arg0, %c0_i32 : i32, i32
  }
  func.func @transform_1(%arg0: i32) -> (i32, i32) {
    %c0_i32 = arith.constant 0 : i32
    %c0_i32_0 = arith.constant 0 : i32
    return %arg0, %c0_i32 : i32, i32
  }
  func.func @transform_2(%arg0: i32) -> (i32, i32) {
    %c0_i32 = arith.constant 0 : i32
    %c0_i32_0 = arith.constant 0 : i32
    %c0_i32_1 = arith.constant 0 : i32
    return %c0_i32, %c0_i32_0 : i32, i32
  }
  func.func @transform_3(%arg0: i32) -> (i32, i32) {
    %c0_i32 = arith.constant 0 : i32
    %c0_i32_0 = arith.constant 0 : i32
    %c0_i32_1 = arith.constant 0 : i32
    return %c0_i32, %c0_i32_0 : i32, i32
  }
  func.func @transform_4(%arg0: i32) -> (i32, i32) {
    %c0_i32 = arith.constant 0 : i32
    %c0_i32_0 = arith.constant 0 : i32
    %c0_i32_1 = arith.constant 0 : i32
    return %c0_i32, %c0_i32_0 : i32, i32
  }
  func.func @transform_5(%arg0: i32) -> (i32, i32) {
    %c0_i32 = arith.constant 0 : i32
    %c0_i32_0 = arith.constant 0 : i32
    %c0_i32_1 = arith.constant 0 : i32
    return %c0_i32, %c0_i32_0 : i32, i32
  }
  func.func @transform_6(%arg0: i32) -> (i32, i32) {
    %c0_i32 = arith.constant 0 : i32
    %c0_i32_0 = arith.constant 0 : i32
    return %arg0, %c0_i32 : i32, i32
  }
}

module attributes {stable_mosaic.version = 11 : i64} {
  func.func @_attn_kernel(%arg0: i32, %arg1: memref<8x96xf32, #tpu.memory_space<vmem>>, %arg2: memref<8x32xf32, #tpu.memory_space<vmem>>) attributes {dimension_semantics = [#tpu.dimension_semantics<parallel>], iteration_bounds = array<i64: 2>, scalar_prefetch = 0 : i64, scratch_operands = 0 : i64, tpu.core_type = #tpu.core_type<tc>, window_params = [{transform_indices = @transform_0, window_bounds = array<i64: 8, 96>}, {transform_indices = @transform_1, window_bounds = array<i64: 8, 32>}]} {
    %c0 = arith.constant 0 : index
    %c0_0 = arith.constant 0 : index
    %0 = vector.load %arg1[%c0, %c0_0] : memref<8x96xf32, #tpu.memory_space<vmem>>, vector<8x96xf32>
    %1 = vector.extract_strided_slice %0 {offsets = [0, 0], sizes = [8, 32], strides = [1, 1]} : vector<8x96xf32> to vector<8x32xf32>
    %cst = arith.constant 2.500000e-01 : f32
    %2 = vector.broadcast %cst : f32 to vector<8x32xf32>
    %3 = arith.mulf %1, %2 : vector<8x32xf32>
    %4 = vector.extract_strided_slice %0 {offsets = [0, 32], sizes = [8, 32], strides = [1, 1]} : vector<8x96xf32> to vector<8x32xf32>
    %5 = vector.extract_strided_slice %0 {offsets = [0, 64], sizes = [8, 32], strides = [1, 1]} : vector<8x96xf32> to vector<8x32xf32>
    %6 = tpu.iota {dimensions = array<i32: 0>} : vector<8x8xi32>
    %7 = tpu.iota {dimensions = array<i32: 1>} : vector<8x8xi32>
    %8 = arith.cmpi sgt, %7, %6 : vector<8x8xi32>
    %9 = vector.extract_strided_slice %3 {offsets = [0, 0], sizes = [8, 16], strides = [1, 1]} : vector<8x32xf32> to vector<8x16xf32>
    %10 = vector.extract_strided_slice %4 {offsets = [0, 0], sizes = [8, 16], strides = [1, 1]} : vector<8x32xf32> to vector<8x16xf32>
    %11 = vector.extract_strided_slice %5 {offsets = [0, 0], sizes = [8, 16], strides = [1, 1]} : vector<8x32xf32> to vector<8x16xf32>
    %cst_1 = arith.constant dense<0.000000e+00> : vector<8x8xf32>
    %12 = tpu.matmul %9, %10, %cst_1 {dimension_numbers = #tpu.dot_dimension_numbers<[1], [1], [0], [0], [0, 0, 1, 0], [], []>} : vector<8x16xf32>, vector<8x16xf32>, vector<8x8xf32> -> vector<8x8xf32>
    %cst_2 = arith.constant -1.000000e+30 : f32
    %13 = vector.broadcast %cst_2 : f32 to vector<8x8xf32>
    %14 = arith.select %8, %13, %12 : vector<8x8xi1>, vector<8x8xf32>
    %cst_3 = arith.constant dense<0xFF800000> : vector<8xf32>
    %15 = vector.multi_reduction <maximumf>, %14, %cst_3 [1] : vector<8x8xf32> to vector<8xf32>
    %16 = vector.shape_cast %15 : vector<8xf32> to vector<8x1xf32>
    %17 = vector.broadcast %16 : vector<8x1xf32> to vector<8x8xf32>
    %18 = arith.subf %14, %17 : vector<8x8xf32>
    %19 = math.exp %18 : vector<8x8xf32>
    %cst_4 = arith.constant dense<0.000000e+00> : vector<8xf32>
    %20 = vector.multi_reduction <add>, %19, %cst_4 [1] : vector<8x8xf32> to vector<8xf32>
    %21 = vector.shape_cast %20 : vector<8xf32> to vector<8x1xf32>
    %22 = tpu.reciprocal %21 {approx = true} : vector<8x1xf32> -> vector<8x1xf32>
    %23 = vector.broadcast %22 : vector<8x1xf32> to vector<8x8xf32>
    %24 = arith.mulf %19, %23 : vector<8x8xf32>
    %cst_5 = arith.constant dense<0.000000e+00> : vector<8x16xf32>
    %25 = tpu.matmul %24, %11, %cst_5 {dimension_numbers = #tpu.dot_dimension_numbers<[1], [0], [0], [1], [0, 0, 1, 1], [], []>} : vector<8x8xf32>, vector<8x16xf32>, vector<8x16xf32> -> vector<8x16xf32>
    %26 = vector.extract_strided_slice %3 {offsets = [0, 16], sizes = [8, 16], strides = [1, 1]} : vector<8x32xf32> to vector<8x16xf32>
    %27 = vector.extract_strided_slice %4 {offsets = [0, 16], sizes = [8, 16], strides = [1, 1]} : vector<8x32xf32> to vector<8x16xf32>
    %28 = vector.extract_strided_slice %5 {offsets = [0, 16], sizes = [8, 16], strides = [1, 1]} : vector<8x32xf32> to vector<8x16xf32>
    %cst_6 = arith.constant dense<0.000000e+00> : vector<8x8xf32>
    %29 = tpu.matmul %26, %27, %cst_6 {dimension_numbers = #tpu.dot_dimension_numbers<[1], [1], [0], [0], [0, 0, 1, 0], [], []>} : vector<8x16xf32>, vector<8x16xf32>, vector<8x8xf32> -> vector<8x8xf32>
    %cst_7 = arith.constant -1.000000e+30 : f32
    %30 = vector.broadcast %cst_7 : f32 to vector<8x8xf32>
    %31 = arith.select %8, %30, %29 : vector<8x8xi1>, vector<8x8xf32>
    %cst_8 = arith.constant dense<0xFF800000> : vector<8xf32>
    %32 = vector.multi_reduction <maximumf>, %31, %cst_8 [1] : vector<8x8xf32> to vector<8xf32>
    %33 = vector.shape_cast %32 : vector<8xf32> to vector<8x1xf32>
    %34 = vector.broadcast %33 : vector<8x1xf32> to vector<8x8xf32>
    %35 = arith.subf %31, %34 : vector<8x8xf32>
    %36 = math.exp %35 : vector<8x8xf32>
    %cst_9 = arith.constant dense<0.000000e+00> : vector<8xf32>
    %37 = vector.multi_reduction <add>, %36, %cst_9 [1] : vector<8x8xf32> to vector<8xf32>
    %38 = vector.shape_cast %37 : vector<8xf32> to vector<8x1xf32>
    %39 = tpu.reciprocal %38 {approx = true} : vector<8x1xf32> -> vector<8x1xf32>
    %40 = vector.broadcast %39 : vector<8x1xf32> to vector<8x8xf32>
    %41 = arith.mulf %36, %40 : vector<8x8xf32>
    %cst_10 = arith.constant dense<0.000000e+00> : vector<8x16xf32>
    %42 = tpu.matmul %41, %28, %cst_10 {dimension_numbers = #tpu.dot_dimension_numbers<[1], [0], [0], [1], [0, 0, 1, 1], [], []>} : vector<8x8xf32>, vector<8x16xf32>, vector<8x16xf32> -> vector<8x16xf32>
    %43 = tpu.concatenate %25, %42 in 1 : vector<8x16xf32>, vector<8x16xf32> -> vector<8x32xf32>
    %c0_11 = arith.constant 0 : index
    %c0_12 = arith.constant 0 : index
    %44 = vector.load %arg2[%c0_11, %c0_12] : memref<8x32xf32, #tpu.memory_space<vmem>>, vector<8x32xf32>
    tpu.vector_store %arg2[%c0_11, %c0_12], %43 {strides = array<i32>} : memref<8x32xf32, #tpu.memory_space<vmem>>, vector<8x32xf32>,
    return
  }
  func.func @transform_0(%arg0: i32) -> (i32, i32) {
    %c0_i32 = arith.constant 0 : i32
    %c0_i32_0 = arith.constant 0 : i32
    return %arg0, %c0_i32 : i32, i32
  }
  func.func @transform_1(%arg0: i32) -> (i32, i32) {
    %c0_i32 = arith.constant 0 : i32
    %c0_i32_0 = arith.constant 0 : i32
    return %arg0, %c0_i32 : i32, i32
  }
}

module attributes {stable_mosaic.version = 11 : i64} {
  func.func @_ffn_add_ln_kernel(%arg0: i32, %arg1: memref<16x32xf32, #tpu.memory_space<vmem>>, %arg2: memref<32x128xf32, #tpu.memory_space<vmem>>, %arg3: memref<1x128xf32, #tpu.memory_space<vmem>>, %arg4: memref<128x32xf32, #tpu.memory_space<vmem>>, %arg5: memref<1x32xf32, #tpu.memory_space<vmem>>, %arg6: memref<1x32xf32, #tpu.memory_space<vmem>>, %arg7: memref<1x32xf32, #tpu.memory_space<vmem>>, %arg8: memref<16x32xf32, #tpu.memory_space<vmem>>) attributes {dimension_semantics = [#tpu.dimension_semantics<parallel>], iteration_bounds = array<i64: 1>, scalar_prefetch = 0 : i64, scratch_operands = 0 : i64, tpu.core_type = #tpu.core_type<tc>, window_params = [{transform_indices = @transform_0, window_bounds = array<i64: 16, 32>}, {pipeline_mode = #tpu.pipeline_mode<synchronous>, transform_indices = @transform_1, window_bounds = array<i64: 32, 128>}, {pipeline_mode = #tpu.pipeline_mode<synchronous>, transform_indices = @transform_2, window_bounds = array<i64: 1, 128>}, {pipeline_mode = #tpu.pipeline_mode<synchronous>, transform_indices = @transform_3, window_bounds = array<i64: 128, 32>}, {pipeline_mode = #tpu.pipeline_mode<synchronous>, transform_indices = @transform_4, window_bounds = array<i64: 1, 32>}, {pipeline_mode = #tpu.pipeline_mode<synchronous>, transform_indices = @transform_5, window_bounds = array<i64: 1, 32>}, {pipeline_mode = #tpu.pipeline_mode<synchronous>, transform_indices = @transform_6, window_bounds = array<i64: 1, 32>}, {transform_indices = @transform_7, window_bounds = array<i64: 16, 32>}]} {
    %c0 = arith.constant 0 : index
    %c0_0 = arith.constant 0 : index
    %0 = vector.load %arg1[%c0, %c0_0] : memref<16x32xf32, #tpu.memory_space<vmem>>, vector<16x32xf32>
    %c0_1 = arith.constant 0 : index
    %c0_2 = arith.constant 0 : index
    %1 = vector.load %arg2[%c0_1, %c0_2] : memref<32x128xf32, #tpu.memory_space<vmem>>, vector<32x128xf32>
    %cst = arith.constant dense<0.000000e+00> : vector<16x128xf32>
    %2 = tpu.matmul %0, %1, %cst {dimension_numbers = #tpu.dot_dimension_numbers<[1], [0], [0], [1], [0, 0, 1, 1], [], []>} : vector<16x32xf32>, vector<32x128xf32>, vector<16x128xf32> -> vector<16x128xf32>
    %c0_3 = arith.constant 0 : index
    %c0_4 = arith.constant 0 : index
    %3 = vector.load %arg3[%c0_3, %c0_4] : memref<1x128xf32, #tpu.memory_space<vmem>>, vector<1x128xf32>
    %4 = vector.broadcast %3 : vector<1x128xf32> to vector<16x128xf32>
    %5 = arith.addf %2, %4 : vector<16x128xf32>
    %cst_5 = arith.constant 0.000000e+00 : f32
    %6 = vector.broadcast %cst_5 : f32 to vector<16x128xf32>
    %7 = arith.maximumf %5, %6 : vector<16x128xf32>
    %c0_6 = arith.constant 0 : index
    %c0_7 = arith.constant 0 : index
    %8 = vector.load %arg4[%c0_6, %c0_7] : memref<128x32xf32, #tpu.memory_space<vmem>>, vector<128x32xf32>
    %cst_8 = arith.constant dense<0.000000e+00> : vector<16x32xf32>
    %9 = tpu.matmul %7, %8, %cst_8 {dimension_numbers = #tpu.dot_dimension_numbers<[1], [0], [0], [1], [0, 0, 1, 1], [], []>} : vector<16x128xf32>, vector<128x32xf32>, vector<16x32xf32> -> vector<16x32xf32>
    %c0_9 = arith.constant 0 : index
    %c0_10 = arith.constant 0 : index
    %10 = vector.load %arg5[%c0_9, %c0_10] : memref<1x32xf32, #tpu.memory_space<vmem>>, vector<1x32xf32>
    %11 = vector.broadcast %10 : vector<1x32xf32> to vector<16x32xf32>
    %12 = arith.addf %9, %11 : vector<16x32xf32>
    %13 = arith.addf %0, %12 : vector<16x32xf32>
    %c0_11 = arith.constant 0 : index
    %c0_12 = arith.constant 0 : index
    %14 = vector.load %arg6[%c0_11, %c0_12] : memref<1x32xf32, #tpu.memory_space<vmem>>, vector<1x32xf32>
    %c0_13 = arith.constant 0 : index
    %c0_14 = arith.constant 0 : index
    %15 = vector.load %arg7[%c0_13, %c0_14] : memref<1x32xf32, #tpu.memory_space<vmem>>, vector<1x32xf32>
    %cst_15 = arith.constant dense<0.000000e+00> : vector<16xf32>
    %16 = vector.multi_reduction <add>, %13, %cst_15 [1] : vector<16x32xf32> to vector<16xf32>
    %17 = vector.shape_cast %16 : vector<16xf32> to vector<16x1xf32>
    %cst_16 = arith.constant 3.200000e+01 : f32
    %18 = vector.broadcast %cst_16 : f32 to vector<16x1xf32>
    %19 = arith.divf %17, %18 : vector<16x1xf32>
    %20 = vector.broadcast %19 : vector<16x1xf32> to vector<16x32xf32>
    %21 = arith.subf %13, %20 : vector<16x32xf32>
    %22 = arith.mulf %21, %21 : vector<16x32xf32>
    %cst_17 = arith.constant dense<0.000000e+00> : vector<16xf32>
    %23 = vector.multi_reduction <add>, %22, %cst_17 [1] : vector<16x32xf32> to vector<16xf32>
    %24 = vector.shape_cast %23 : vector<16xf32> to vector<16x1xf32>
    %cst_18 = arith.constant 3.200000e+01 : f32
    %25 = vector.broadcast %cst_18 : f32 to vector<16x1xf32>
    %26 = arith.divf %24, %25 : vector<16x1xf32>
    %27 = vector.broadcast %19 : vector<16x1xf32> to vector<16x32xf32>
    %28 = arith.subf %13, %27 : vector<16x32xf32>
    %cst_19 = arith.constant 9.99999974E-6 : f32
    %29 = vector.broadcast %cst_19 : f32 to vector<16x1xf32>
    %30 = arith.addf %26, %29 : vector<16x1xf32>
    %31 = math.rsqrt %30 : vector<16x1xf32>
    %32 = vector.broadcast %31 : vector<16x1xf32> to vector<16x32xf32>
    %33 = arith.mulf %28, %32 : vector<16x32xf32>
    %34 = vector.broadcast %14 : vector<1x32xf32> to vector<16x32xf32>
    %35 = arith.mulf %33, %34 : vector<16x32xf32>
    %36 = vector.broadcast %15 : vector<1x32xf32> to vector<16x32xf32>
    %37 = arith.addf %35, %36 : vector<16x32xf32>
    %c0_20 = arith.constant 0 : index
    %c0_21 = arith.constant 0 : index
    %38 = vector.load %arg8[%c0_20, %c0_21] : memref<16x32xf32, #tpu.memory_space<vmem>>, vector<16x32xf32>
    tpu.vector_store %arg8[%c0_20, %c0_21], %37 {strides = array<i32>} : memref<16x32xf32, #tpu.memory_space<vmem>>, vector<16x32xf32>,
    return
  }
  func.func @transform_0(%arg0: i32) -> (i32, i32) {
    %c0_i32 = arith.constant 0 : i32
    %c0_i32_0 = arith.constant 0 : i32
    return %arg0, %c0_i32 : i32, i32
  }
  func.func @transform_1(%arg0: i32) -> (i32, i32) {
    %c0_i32 = arith.constant 0 : i32
    %c0_i32_0 = arith.constant 0 : i32
    %c0_i32_1 = arith.constant 0 : i32
    return %c0_i32, %c0_i32_0 : i32, i32
  }
  func.func @transform_2(%arg0: i32) -> (i32, i32) {
    %c0_i32 = arith.constant 0 : i32
    %c0_i32_0 = arith.constant 0 : i32
    %c0_i32_1 = arith.constant 0 : i32
    return %c0_i32, %c0_i32_0 : i32, i32
  }
  func.func @transform_3(%arg0: i32) -> (i32, i32) {
    %c0_i32 = arith.constant 0 : i32
    %c0_i32_0 = arith.constant 0 : i32
    %c0_i32_1 = arith.constant 0 : i32
    return %c0_i32, %c0_i32_0 : i32, i32
  }
  func.func @transform_4(%arg0: i32) -> (i32, i32) {
    %c0_i32 = arith.constant 0 : i32
    %c0_i32_0 = arith.constant 0 : i32
    %c0_i32_1 = arith.constant 0 : i32
    return %c0_i32, %c0_i32_0 : i32, i32
  }
  func.func @transform_5(%arg0: i32) -> (i32, i32) {
    %c0_i32 = arith.constant 0 : i32
    %c0_i32_0 = arith.constant 0 : i32
    %c0_i32_1 = arith.constant 0 : i32
    return %c0_i32, %c0_i32_0 : i32, i32
  }
  func.func @transform_6(%arg0: i32) -> (i32, i32) {
    %c0_i32 = arith.constant 0 : i32
    %c0_i32_0 = arith.constant 0 : i32
    %c0_i32_1 = arith.constant 0 : i32
    return %c0_i32, %c0_i32_0 : i32, i32
  }
  func.func @transform_7(%arg0: i32) -> (i32, i32) {
    %c0_i32 = arith.constant 0 : i32
    %c0_i32_0 = arith.constant 0 : i32
    return %arg0, %c0_i32 : i32, i32
  }
}

module attributes {stable_mosaic.version = 11 : i64} {
  func.func @_ffn_add_ln_kernel(%arg0: i32, %arg1: memref<16x32xf32, #tpu.memory_space<vmem>>, %arg2: memref<32x128xf32, #tpu.memory_space<vmem>>, %arg3: memref<1x128xf32, #tpu.memory_space<vmem>>, %arg4: memref<128x32xf32, #tpu.memory_space<vmem>>, %arg5: memref<1x32xf32, #tpu.memory_space<vmem>>, %arg6: memref<1x32xf32, #tpu.memory_space<vmem>>, %arg7: memref<1x32xf32, #tpu.memory_space<vmem>>, %arg8: memref<16x32xf32, #tpu.memory_space<vmem>>) attributes {dimension_semantics = [#tpu.dimension_semantics<parallel>], iteration_bounds = array<i64: 1>, scalar_prefetch = 0 : i64, scratch_operands = 0 : i64, tpu.core_type = #tpu.core_type<tc>, window_params = [{transform_indices = @transform_0, window_bounds = array<i64: 16, 32>}, {pipeline_mode = #tpu.pipeline_mode<synchronous>, transform_indices = @transform_1, window_bounds = array<i64: 32, 128>}, {pipeline_mode = #tpu.pipeline_mode<synchronous>, transform_indices = @transform_2, window_bounds = array<i64: 1, 128>}, {pipeline_mode = #tpu.pipeline_mode<synchronous>, transform_indices = @transform_3, window_bounds = array<i64: 128, 32>}, {pipeline_mode = #tpu.pipeline_mode<synchronous>, transform_indices = @transform_4, window_bounds = array<i64: 1, 32>}, {pipeline_mode = #tpu.pipeline_mode<synchronous>, transform_indices = @transform_5, window_bounds = array<i64: 1, 32>}, {pipeline_mode = #tpu.pipeline_mode<synchronous>, transform_indices = @transform_6, window_bounds = array<i64: 1, 32>}, {transform_indices = @transform_7, window_bounds = array<i64: 16, 32>}]} {
    %c0 = arith.constant 0 : index
    %c0_0 = arith.constant 0 : index
    %0 = vector.load %arg1[%c0, %c0_0] : memref<16x32xf32, #tpu.memory_space<vmem>>, vector<16x32xf32>
    %c0_1 = arith.constant 0 : index
    %c0_2 = arith.constant 0 : index
    %1 = vector.load %arg2[%c0_1, %c0_2] : memref<32x128xf32, #tpu.memory_space<vmem>>, vector<32x128xf32>
    %cst = arith.constant dense<0.000000e+00> : vector<16x128xf32>
    %2 = tpu.matmul %0, %1, %cst {dimension_numbers = #tpu.dot_dimension_numbers<[1], [0], [0], [1], [0, 0, 1, 1], [], []>} : vector<16x32xf32>, vector<32x128xf32>, vector<16x128xf32> -> vector<16x128xf32>
    %c0_3 = arith.constant 0 : index
    %c0_4 = arith.constant 0 : index
    %3 = vector.load %arg3[%c0_3, %c0_4] : memref<1x128xf32, #tpu.memory_space<vmem>>, vector<1x128xf32>
    %4 = vector.broadcast %3 : vector<1x128xf32> to vector<16x128xf32>
    %5 = arith.addf %2, %4 : vector<16x128xf32>
    %cst_5 = arith.constant 0.000000e+00 : f32
    %6 = vector.broadcast %cst_5 : f32 to vector<16x128xf32>
    %7 = arith.maximumf %5, %6 : vector<16x128xf32>
    %c0_6 = arith.constant 0 : index
    %c0_7 = arith.constant 0 : index
    %8 = vector.load %arg4[%c0_6, %c0_7] : memref<128x32xf32, #tpu.memory_space<vmem>>, vector<128x32xf32>
    %cst_8 = arith.constant dense<0.000000e+00> : vector<16x32xf32>
    %9 = tpu.matmul %7, %8, %cst_8 {dimension_numbers = #tpu.dot_dimension_numbers<[1], [0], [0], [1], [0, 0, 1, 1], [], []>} : vector<16x128xf32>, vector<128x32xf32>, vector<16x32xf32> -> vector<16x32xf32>
    %c0_9 = arith.constant 0 : index
    %c0_10 = arith.constant 0 : index
    %10 = vector.load %arg5[%c0_9, %c0_10] : memref<1x32xf32, #tpu.memory_space<vmem>>, vector<1x32xf32>
    %11 = vector.broadcast %10 : vector<1x32xf32> to vector<16x32xf32>
    %12 = arith.addf %9, %11 : vector<16x32xf32>
    %13 = arith.addf %0, %12 : vector<16x32xf32>
    %c0_11 = arith.constant 0 : index
    %c0_12 = arith.constant 0 : index
    %14 = vector.load %arg6[%c0_11, %c0_12] : memref<1x32xf32, #tpu.memory_space<vmem>>, vector<1x32xf32>
    %c0_13 = arith.constant 0 : index
    %c0_14 = arith.constant 0 : index
    %15 = vector.load %arg7[%c0_13, %c0_14] : memref<1x32xf32, #tpu.memory_space<vmem>>, vector<1x32xf32>
    %cst_15 = arith.constant dense<0.000000e+00> : vector<16xf32>
    %16 = vector.multi_reduction <add>, %13, %cst_15 [1] : vector<16x32xf32> to vector<16xf32>
    %17 = vector.shape_cast %16 : vector<16xf32> to vector<16x1xf32>
    %cst_16 = arith.constant 3.200000e+01 : f32
    %18 = vector.broadcast %cst_16 : f32 to vector<16x1xf32>
    %19 = arith.divf %17, %18 : vector<16x1xf32>
    %20 = vector.broadcast %19 : vector<16x1xf32> to vector<16x32xf32>
    %21 = arith.subf %13, %20 : vector<16x32xf32>
    %22 = arith.mulf %21, %21 : vector<16x32xf32>
    %cst_17 = arith.constant dense<0.000000e+00> : vector<16xf32>
    %23 = vector.multi_reduction <add>, %22, %cst_17 [1] : vector<16x32xf32> to vector<16xf32>
    %24 = vector.shape_cast %23 : vector<16xf32> to vector<16x1xf32>
    %cst_18 = arith.constant 3.200000e+01 : f32
    %25 = vector.broadcast %cst_18 : f32 to vector<16x1xf32>
    %26 = arith.divf %24, %25 : vector<16x1xf32>
    %27 = vector.broadcast %19 : vector<16x1xf32> to vector<16x32xf32>
    %28 = arith.subf %13, %27 : vector<16x32xf32>
    %cst_19 = arith.constant 9.99999974E-6 : f32
    %29 = vector.broadcast %cst_19 : f32 to vector<16x1xf32>
    %30 = arith.addf %26, %29 : vector<16x1xf32>
    %31 = math.rsqrt %30 : vector<16x1xf32>
    %32 = vector.broadcast %31 : vector<16x1xf32> to vector<16x32xf32>
    %33 = arith.mulf %28, %32 : vector<16x32xf32>
    %34 = vector.broadcast %14 : vector<1x32xf32> to vector<16x32xf32>
    %35 = arith.mulf %33, %34 : vector<16x32xf32>
    %36 = vector.broadcast %15 : vector<1x32xf32> to vector<16x32xf32>
    %37 = arith.addf %35, %36 : vector<16x32xf32>
    %c0_20 = arith.constant 0 : index
    %c0_21 = arith.constant 0 : index
    %38 = vector.load %arg8[%c0_20, %c0_21] : memref<16x32xf32, #tpu.memory_space<vmem>>, vector<16x32xf32>
    tpu.vector_store %arg8[%c0_20, %c0_21], %37 {strides = array<i32>} : memref<16x32xf32, #tpu.memory_space<vmem>>, vector<16x32xf32>,
    return
  }
  func.func @transform_0(%arg0: i32) -> (i32, i32) {
    %c0_i32 = arith.constant 0 : i32
    %c0_i32_0 = arith.constant 0 : i32
    return %arg0, %c0_i32 : i32, i32
  }
  func.func @transform_1(%arg0: i32) -> (i32, i32) {
    %c0_i32 = arith.constant 0 : i32
    %c0_i32_0 = arith.constant 0 : i32
    %c0_i32_1 = arith.constant 0 : i32
    return %c0_i32, %c0_i32_0 : i32, i32
  }
  func.func @transform_2(%arg0: i32) -> (i32, i32) {
    %c0_i32 = arith.constant 0 : i32
    %c0_i32_0 = arith.constant 0 : i32
    %c0_i32_1 = arith.constant 0 : i32
    return %c0_i32, %c0_i32_0 : i32, i32
  }
  func.func @transform_3(%arg0: i32) -> (i32, i32) {
    %c0_i32 = arith.constant 0 : i32
    %c0_i32_0 = arith.constant 0 : i32
    %c0_i32_1 = arith.constant 0 : i32
    return %c0_i32, %c0_i32_0 : i32, i32
  }
  func.func @transform_4(%arg0: i32) -> (i32, i32) {
    %c0_i32 = arith.constant 0 : i32
    %c0_i32_0 = arith.constant 0 : i32
    %c0_i32_1 = arith.constant 0 : i32
    return %c0_i32, %c0_i32_0 : i32, i32
  }
  func.func @transform_5(%arg0: i32) -> (i32, i32) {
    %c0_i32 = arith.constant 0 : i32
    %c0_i32_0 = arith.constant 0 : i32
    %c0_i32_1 = arith.constant 0 : i32
    return %c0_i32, %c0_i32_0 : i32, i32
  }
  func.func @transform_6(%arg0: i32) -> (i32, i32) {
    %c0_i32 = arith.constant 0 : i32
    %c0_i32_0 = arith.constant 0 : i32
    %c0_i32_1 = arith.constant 0 : i32
    return %c0_i32, %c0_i32_0 : i32, i32
  }
  func.func @transform_7(%arg0: i32) -> (i32, i32) {
    %c0_i32 = arith.constant 0 : i32
    %c0_i32_0 = arith.constant 0 : i32
    return %arg0, %c0_i32 : i32, i32
  }
}

</mosaic_0001>

<bundles_post_ra>
// kernel: sasrec_forward.9
= control target key start
LH: loop header
LB: loop body
LE: loop exit
PB: predicated region body
PF: predicated region fallthrough
CT: control target
= control target key end

     0   :  { %s335_s15 = smov 0   ;;  %s364_s0 = inlined_call_operand.vmem [shape: f32[16,32], index: 0, kind: input, shape index: {}]   ;;  %s365_s1 = inlined_call_operand.vmem [shape: f32[8,32], index: 1, kind: input, shape index: {}]   ;;  %s366_s2 = inlined_call_operand.vmem [shape: f32[1,32], index: 2, kind: input, shape index: {}]   ;;  %s367_s3 = inlined_call_operand.vmem [shape: f32[1,32], index: 3, kind: input, shape index: {}]   ;;  %s368_s4 = inlined_call_operand.vmem [shape: f32[16,32], index: 4, kind: output, shape index: {}]  }
   0x1 LB: > { %s281_s16 = sadd.s32 4294967295, %s308_s15   ;;  %p285_p0 = scmp.ge.s32.totalorder %s308_s15, 1  ;;  %s308_s15 = sphi %s335_s15, %s14_s15  }
   0x2   : > { %p161_p1 = scmp.lt.s32.totalorder %s308_s15, 3 }
   0x4   : > { %p162_p2 = pnand %p285_p0, %p161_p1 }
   0x5   : > { %p185_p3 = scmp.lt.s32.totalorder (!%p162_p2), %s281_s16, 1 }
   0x6   : > { %165 = sbr.rel (%p162_p2) target bundleno = 326 (0x146), region = 36 }
   0xb   : > { %s370_s16 = smov (!%p185_p3, %s281_s16), 1  ;;  %v194_v0 = vld [vmem:[%s365_s1] sm:$0xff]  ;;  %vm198_vm0 = vcmask 261120  }
   0xc   : > { %s286_s17 = sshll.u32 %s370_s16, 3  ;;  %v288_v13 = vld [vmem:[%s366_s2] ss:$0 sm:$0xff] }
   0xd   : > { %s188_s22 = scalar_lea.vmem %s364_s0, %s286_s17  ;;  %v289_v15 = vld [vmem:[%s367_s3] ss:$0 sm:$0xff]  ;;  %s192_s29 = scalar_lea.vmem %s368_s4, %s286_s17 }
   0xe   : > { %v193_v1 = vld [vmem:[%s188_s22] sm:$0xff] }
   0xf   : > { %v195_v2 = vadd.f32 %v194_v0, %v193_v1 }
  0x11   : > { %v199_v3 = vsel %vm198_vm0, %v195_v2, 0.0 }
  0x12   : > { %200 = vadd.xlane.f32.xlu0 %v199_v3 }
  0x9b   : > { %v201_v4 = vpop.xlane.xlu0 %200 }
  0x9c   : > { %v203_v5 = vmul.f32 0.03125, %v201_v4 }
  0x9e   : > { %v204_v6 = vsub.f32 %v195_v2, %v203_v5 }
  0xa0   : > { %v205_v7 = vmul.f32 %v204_v6, %v204_v6 }
  0xa2   : > { %v206_v8 = vsel %vm198_vm0, %v205_v7, 0.0 }
  0xa3   : > { %207 = vadd.xlane.f32.xlu0 %v206_v8 }
 0x12c   : > { %v208_v9 = vpop.xlane.xlu0 %207 }
 0x12d   : > { %v209_v10 = vmul.f32 0.03125, %v208_v9 }
 0x12f   : > { %v210_v11 = vadd.f32 1e-05, %v209_v10 }
 0x131   : > { %300 = vrsqrt.f32 %v210_v11 }
 0x13e   : > { %v301_v12 = vpop.eup %300 }
 0x13f   : > { %v212_v14 = vmul.f32 %v301_v12, %v204_v6 }
 0x141   : > { %v219_v16 = vmul.f32 %v288_v13, %v212_v14 }
 0x143   : > { %v226_v17 = vadd.f32 %v289_v15, %v219_v16 }
 0x145   : > { %227 = vst.msk [vmem:[%s192_s29] sm:$0xff] %vm198_vm0, %v226_v17 }
 0x146 PF: > { %s14_s15 = sadd.s32 1, %s308_s15  }
 0x147   : > { %p11_p4 = scmp.ge.s32.totalorder %s14_s15, 4  }
 0x149   :  { %13 = sbr.rel (!%p11_p4) target bundleno = 1 (0x1), region = 66 }

// kernel: sasrec_forward.10
= control target key start
LH: loop header
LB: loop body
LE: loop exit
PB: predicated region body
PF: predicated region fallthrough
CT: control target
= control target key end

     0   :  { %vm27_vm0 = vcmask 261120   ;;  %vm109_vm1 = vcmask 785408   ;;  %s185_s1 = inlined_call_operand.vmem [shape: f32[32,96], index: 1, kind: input, shape index: {}]   ;;  %s186_s0 = inlined_call_operand.vmem [shape: f32[16,32], index: 0, kind: input, shape index: {}]   ;;  %s187_s2 = inlined_call_operand.vmem [shape: f32[1,96], index: 2, kind: input, shape index: {}]   ;;  %s188_s3 = inlined_call_operand.vmem [shape: f32[16,96], index: 3, kind: output, shape index: {}]  }
   0x1   :  { %v19_v0 = vld [vmem:[%s185_s1 + $0x18] sm:$0xff]  ;;  %v18_v1 = vld [vmem:[%s185_s1 + $0x10] sm:$0xff]  ;;  %v14_v2 = vld [vmem:[%s186_s0] sm:$0xff] }
   0x2   :  { %125 = vmatprep.subr.mxu0 %v19_v0  ;;  %v17_v3 = vld [vmem:[%s185_s1 + $0x8] sm:$0xff]  ;;  %133 = vmatprep.mubr.msk.f32.mxu0 %vm27_vm0, %v14_v2  ;;  %v16_v4 = vld [vmem:[%s185_s1] sm:$0xff] }
   0x3   :  { %126 = vmatpush3.msra.mxu0 %v19_v0  ;;  %v15_v5 = vld [vmem:[%s186_s0 + $0x8] sm:$0xff]  ;;  %v116_v6 = vld [vmem:[%s187_s2] ss:$0 sm:$0xff] }
   0x4   :  { %127 = vmatprep.subr.mxu0 %v18_v1 }
   0x5   :  { %128 = vmatpush3.msra.mxu0 %v18_v1 }
   0x6   :  { %129 = vmatprep.subr.mxu0 %v17_v3 }
   0x7   :  { %130 = vmatpush3.msra.mxu0 %v17_v3 }
   0x8   :  { %131 = vmatprep.subr.mxu0 %v16_v4 }
   0x9   :  { %132 = vmatpush3.msra.mxu0 %v16_v4 }
   0xa   :  { %134 = vmatmul.mubr.msk.f32.vlgmr.msra.gmra.mxu0 %vm27_vm0, %v15_v5 }
  0xca   :  { %v135_v7 = vpop.f32.mrf.mxu0 }
  0xcb   :  { %v106_v8 = vadd.f32 %v135_v7, %v116_v6 }
  0xcc   :  { %v100_v9 = vpop.f32.mrf.mxu0 }
  0xcd   :  { %111 = vst.msk [vmem:[%s188_s3 + $0x8] sm:$0xff] %vm109_vm1, %v106_v8  ;;  %v101_v10 = vadd.f32 %v116_v6, %v100_v9 }
  0xcf   :  { %110 = vst.msk [vmem:[%s188_s3] sm:$0xff] %vm109_vm1, %v101_v10 }

// kernel: sasrec_forward.12
= control target key start
LH: loop header
LB: loop body
LE: loop exit
PB: predicated region body
PF: predicated region fallthrough
CT: control target
= control target key end

     0   :  { %vm36_vm0 = vcmask 261120   ;;  %s281_s2 = inlined_call_operand.vmem [shape: f32[32,32], index: 2, kind: input, shape index: {}]   ;;  %s282_s0 = inlined_call_operand.vmem [shape: f32[16,32], index: 0, kind: input, shape index: {}]   ;;  %s283_s3 = inlined_call_operand.vmem [shape: f32[1,32], index: 3, kind: input, shape index: {}]   ;;  %s284_s1 = inlined_call_operand.vmem [shape: f32[16,32], index: 1, kind: input, shape index: {}]   ;;  %s285_s4 = inlined_call_operand.vmem [shape: f32[1,32], index: 4, kind: input, shape index: {}]   ;;  %s286_s5 = inlined_call_operand.vmem [shape: f32[1,32], index: 5, kind: input, shape index: {}]   ;;  %s287_s6 = inlined_call_operand.vmem [shape: f32[16,32], index: 6, kind: output, shape index: {}]  }
   0x1   :  { %v28_v0 = vld [vmem:[%s281_s2 + $0x18] sm:$0xff]  ;;  %v27_v1 = vld [vmem:[%s281_s2 + $0x10] sm:$0xff]  ;;  %v23_v2 = vld [vmem:[%s282_s0] sm:$0xff] }
   0x2   :  { %184 = vmatprep.subr.mxu0 %v28_v0  ;;  %v26_v3 = vld [vmem:[%s281_s2 + $0x8] sm:$0xff]  ;;  %192 = vmatprep.mubr.msk.f32.mxu0 %vm36_vm0, %v23_v2  ;;  %v25_v4 = vld [vmem:[%s281_s2] sm:$0xff] }
   0x3   :  { %185 = vmatpush3.msra.mxu0 %v28_v0  ;;  %v24_v5 = vld [vmem:[%s282_s0 + $0x8] sm:$0xff]  ;;  %v173_v7 = vld [vmem:[%s283_s3] ss:$0 sm:$0xff] }
   0x4   :  { %186 = vmatprep.subr.mxu0 %v27_v1  ;;  %v118_v9 = vld [vmem:[%s284_s1] sm:$0xff]  ;;  %v119_v12 = vld [vmem:[%s284_s1 + $0x8] sm:$0xff] }
   0x5   :  { %187 = vmatpush3.msra.mxu0 %v27_v1  ;;  %v176_v34 = vld [vmem:[%s285_s4] ss:$0 sm:$0xff] }
   0x6   :  { %188 = vmatprep.subr.mxu0 %v26_v3  ;;  %v177_v36 = vld [vmem:[%s286_s5] ss:$0 sm:$0xff] }
   0x7   :  { %189 = vmatpush3.msra.mxu0 %v26_v3 }
   0x8   :  { %190 = vmatprep.subr.mxu0 %v25_v4 }
   0x9   :  { %191 = vmatpush3.msra.mxu0 %v25_v4 }
   0xa   :  { %193 = vmatmul.mubr.msk.f32.vlgmr.msra.gmra.mxu0 %vm36_vm0, %v24_v5 }
  0xca   :  { %v194_v6 = vpop.f32.mrf.mxu0 }
  0xcb   :  { %v115_v10 = vadd.f32 %v194_v6, %v173_v7 }
  0xcc   :  { %v109_v8 = vpop.f32.mrf.mxu0 }
  0xcd   :  { %v110_v11 = vadd.f32 %v173_v7, %v109_v8  ;;  %v121_v15 = vadd.f32 %v119_v12, %v115_v10 }
  0xcf   :  { %v120_v13 = vadd.f32 %v118_v9, %v110_v11  ;;  %v127_v16 = vsel %vm36_vm0, %v121_v15, 0.0 }
  0xd1   :  { %v124_v14 = vsel %vm36_vm0, %v120_v13, 0.0 }
  0xd2   :  { %125 = vadd.xlane.f32.xlu0 %v124_v14 }
  0xd6   :  { %128 = vadd.xlane.f32.xlu0 %v127_v16 }
 0x15b   :  { %v126_v17 = vpop.xlane.xlu0 %125 }
 0x15c   :  { %v131_v18 = vmul.f32 0.03125, %v126_v17 }
 0x15e   :  { %v133_v19 = vsub.f32 %v120_v13, %v131_v18 }
 0x15f   :  { %v129_v20 = vpop.xlane.xlu0 %128 }
 0x160   :  { %v132_v21 = vmul.f32 0.03125, %v129_v20  ;;  %v135_v22 = vmul.f32 %v133_v19, %v133_v19 }
 0x162   :  { %v134_v23 = vsub.f32 %v121_v15, %v132_v21  ;;  %v137_v24 = vsel %vm36_vm0, %v135_v22, 0.0 }
 0x163   :  { %138 = vadd.xlane.f32.xlu1 %v137_v24 }
 0x164   :  { %v136_v25 = vmul.f32 %v134_v23, %v134_v23 }
 0x166   :  { %v140_v26 = vsel %vm36_vm0, %v136_v25, 0.0 }
 0x167   :  { %141 = vadd.xlane.f32.xlu1 %v140_v26 }
 0x1ec   :  { %v139_v27 = vpop.xlane.xlu1 %138 }
 0x1ed   :  { %v143_v28 = vmul.f32 0.03125, %v139_v27 }
 0x1ef   :  { %v145_v29 = vadd.f32 1e-05, %v143_v28 }
 0x1f0   :  { %v142_v30 = vpop.xlane.xlu1 %141 }
 0x1f1   :  { %195 = vrsqrt.f32 %v145_v29  ;;  %v144_v31 = vmul.f32 0.03125, %v142_v30 }
 0x1f3   :  { %v146_v32 = vadd.f32 1e-05, %v144_v31 }
 0x1f5   :  { %197 = vrsqrt.f32 %v146_v32 }
 0x1fe   :  { %v196_v33 = vpop.eup %195 }
 0x1ff   :  { %v149_v35 = vmul.f32 %v196_v33, %v133_v19 }
 0x201   :  { %v157_v37 = vmul.f32 %v176_v34, %v149_v35 }
 0x202   :  { %v198_v38 = vpop.eup %197 }
 0x203   :  { %v165_v39 = vadd.f32 %v177_v36, %v157_v37  ;;  %v150_v40 = vmul.f32 %v198_v38, %v134_v23 }
 0x205   :  { %167 = vst.msk [vmem:[%s287_s6] sm:$0xff] %vm36_vm0, %v165_v39  ;;  %v158_v41 = vmul.f32 %v176_v34, %v150_v40 }
 0x207   :  { %v166_v42 = vadd.f32 %v177_v36, %v158_v41 }
 0x209   :  { %168 = vst.msk [vmem:[%s287_s6 + $0x8] sm:$0xff] %vm36_vm0, %v166_v42 }

// kernel: sasrec_forward.11
= control target key start
LH: loop header
LB: loop body
LE: loop exit
PB: predicated region body
PF: predicated region fallthrough
CT: control target
= control target key end

     0   :  { %s606_s6 = smov 0   ;;  %s647_s0 = inlined_call_operand.vmem [shape: f32[16,96], index: 0, kind: input, shape index: {}]   ;;  %s648_s1 = inlined_call_operand.vmem [shape: f32[16,32], index: 1, kind: output, shape index: {}]  }
   0x1 LB: > { %s513_s7 = sadd.s32 4294967295, %s586_s6   ;;  %p517_p0 = scmp.ge.s32.totalorder %s586_s6, 1  ;;  %s586_s6 = sphi %s606_s6, %s11_s6  }
   0x2   : > { %p86_p1 = scmp.lt.s32.totalorder %s586_s6, 3 }
   0x4   : > { %p87_p2 = pnand %p517_p0, %p86_p1 }
   0x5   : > { %p104_p3 = scmp.lt.s32.totalorder (!%p87_p2), %s513_s7, 1  ;;  %s590_s12 = smov (!%p87_p2), 96  }
   0x6   : > { %90 = sbr.rel (%p87_p2) target bundleno = 1459 (0x5b3), region = 24  ;;  %s591_s13 = smov (!%p87_p2), 64  }
   0x7   : > { %s592_s14 = smov (!%p87_p2), 80   ;;  %s593_s15 = smov (!%p87_p2), 112  }
   0x8   : > { %s594_s16 = smov (!%p87_p2), 48   ;;  %s595_s17 = smov (!%p87_p2), 16  }
   0xb   : > { %v588_v0 = vmov 0.0   ;;  %vm589_vm0 = vmmov 0   ;;  %s650_s7 = smov (!%p104_p3, %s513_s7), 1  ;;  %vm122_vm1 = vcmask 130048   ;;  %v114_v4 = vlaneseq }
   0xc   : > { %536 = vmatprep.subr.mxu0 %v588_v0  ;;  %538 = vmatprep.mubr.msk.f32.mxu0 %vm589_vm0, %v588_v0  ;;  %s518_s8 = sshll.u32 %s650_s7, 3  ;;  %vm199_vm3 = vcmask 64512   ;;  %vm458_vm4 = vcmask 261120  }
   0xd   : > { %541 = vmatprep.subr.mxu1 %v588_v0  ;;  %543 = vmatprep.mubr.msk.f32.mxu1 %vm589_vm0, %v588_v0  ;;  %s107_s11 = scalar_lea.vmem %s647_s0, %s518_s8  ;;  %v115_v5 = vshrl.u32 %v114_v4, 7  ;;  %v117_v6 = vand.u32 127, %v114_v4  ;;  %s111_s20 = scalar_lea.vmem %s648_s1, %s518_s8 }
   0xe   : > { %v112_v1 = vld [vmem:[%s107_s11] sm:$0xff] }
   0xf   : > { %120 = vrot.lane.b32.xlu0 %v112_v1, %s590_s12  ;;  %v113_v3 = vmul.f32 0.25, %v112_v1  ;;  %211 = vrot.lane.b32.xlu1 %v112_v1, %s591_s13  ;;  %vm118_vm2 = vcmp.gt.s32.totalorder %v117_v6, %v115_v5 }
  0x13   : > { %289 = vrot.lane.b32.xlu1 %v112_v1, %s592_s14 }
  0x81   : > { %v121_v2 = vpop.permute.xlu0 %120  ;;  %v212_v11 = vpop.permute.xlu1 %211 }
  0x82   : > { %537 = vmatpush3.xpose.msk.msra.mxu0 %vm122_vm1, %v121_v2  ;;  %542 = vmatpush3.msra.mxu1 %v212_v11 }
  0x83   : > { %551 = vmatprep.subr.mxu0 %v588_v0  ;;  %546 = vmatprep.subr.mxu1 %v588_v0 }
  0x85   : > { %539 = vmatmul.mubr.msk.f32.vlgmr.msra.gmra.mxu0 %vm122_vm1, %v113_v3  ;;  %v290_v17 = vpop.permute.xlu1 %289 }
  0x86   : > { %553 = vmatprep.mubr.msk.f32.mxu0 %vm589_vm0, %v588_v0 }
 0x145   : > { %v194_v7 = vpop.f32.mrf.mxu0 }
 0x146   : > { %v198_v8 = vsel %vm118_vm2, -1e+30, %v194_v7 }
 0x147   : > { %v540_v9 = vpop.f32.mrf.mxu0  ;;  %v200_v10 = vsel %vm199_vm3, %v198_v8, -inf }
 0x148   : > { %201 = vmax.xlane.f32.xlu0 %v200_v10 }
 0x1d1   : > { %v202_v12 = vpop.xlane.xlu0 %201 }
 0x1d2   : > { %v203_v13 = vsub.f32 %v198_v8, %v202_v12 }
 0x1d4   : > { %v204_v14 = vmul.f32 1.442695, %v203_v13 }
 0x1d6   : > { %572 = vpow2.f32 %v204_v14 }
 0x1e3   : > { %v573_v15 = vpop.eup %572 }
 0x1e4   : > { %v206_v16 = vsel %vm199_vm3, %v573_v15, 0.0 }
 0x1e5   : > { %207 = vadd.xlane.f32.xlu1 %v206_v16 }
 0x1f6   : > { %287 = vrot.lane.b32.xlu1 %v113_v3, %s593_s15 }
 0x26e   : > { %v208_v18 = vpop.xlane.xlu1 %207 }
 0x26f   : > { %574 = vrcp.f32 %v208_v18 }
 0x272   : > { %v288_v21 = vpop.permute.xlu1 %287 }
 0x27c   : > { %v575_v19 = vpop.eup %574 }
 0x27d   : > { %v210_v20 = vmul.f32 %v575_v19, %v573_v15 }
 0x27f   : > { %544 = vmatmul.mubr.msk.f32.vlgmr.msra.gmra.mxu1 %vm199_vm3, %v210_v20 }
 0x280   : > { %547 = vmatpush3.xpose.msk.msra.mxu1 %vm122_vm1, %v290_v17  ;;  %548 = vmatprep.mubr.msk.f32.mxu1 %vm589_vm0, %v588_v0 }
 0x283   : > { %549 = vmatmul.mubr.msk.f32.vlgmr.msra.gmra.mxu1 %vm122_vm1, %v288_v21 }
 0x33f   : > { %v283_v22 = vpop.f32.mrf.mxu1 }
 0x341   : > { %v545_v23 = vpop.f32.mrf.mxu1 }
 0x343   : > { %v361_v24 = vpop.f32.mrf.mxu1 }
 0x344   : > { %v365_v25 = vsel %vm118_vm2, -1e+30, %v361_v24 }
 0x345   : > { %v550_v26 = vpop.f32.mrf.mxu1  ;;  %v366_v27 = vsel %vm199_vm3, %v365_v25, -inf }
 0x346   : > { %367 = vmax.xlane.f32.xlu1 %v366_v27 }
 0x3cf   : > { %v368_v28 = vpop.xlane.xlu1 %367 }
 0x3d0   : > { %v369_v29 = vsub.f32 %v365_v25, %v368_v28 }
 0x3d2   : > { %v370_v30 = vmul.f32 1.442695, %v369_v29 }
 0x3d4   : > { %576 = vpow2.f32 %v370_v30 }
 0x3e1   : > { %v577_v31 = vpop.eup %576 }
 0x3e2   : > { %v372_v32 = vsel %vm199_vm3, %v577_v31, 0.0 }
 0x3e3   : > { %373 = vadd.xlane.f32.xlu0 %v372_v32 }
 0x3f9   : > { %377 = vrot.lane.b32.xlu0 %v112_v1, %s594_s16 }
 0x46c   : > { %v374_v33 = vpop.xlane.xlu0 %373 }
 0x46d   : > { %578 = vrcp.f32 %v374_v33 }
 0x470   : > { %v378_v34 = vpop.permute.xlu0 %377 }
 0x471   : > { %552 = vmatpush3.msra.mxu0 %v378_v34 }
 0x47a   : > { %v579_v35 = vpop.eup %578 }
 0x47b   : > { %v376_v36 = vmul.f32 %v579_v35, %v577_v31 }
 0x47d   : > { %554 = vmatmul.mubr.msk.f32.vlgmr.msra.gmra.mxu0 %vm199_vm3, %v376_v36 }
 0x53d   : > { %v449_v37 = vpop.f32.mrf.mxu0 }
 0x53e   : > { %454 = vrot.lane.b32.xlu0 %v449_v37, %s595_s17 }
 0x53f   : > { %v555_v38 = vpop.f32.mrf.mxu0 }
 0x5b0   : > { %v455_v39 = vpop.permute.xlu0 %454 }
 0x5b1   : > { %v457_v40 = vsel %vm122_vm1, %v283_v22, %v455_v39 }
 0x5b2   : > { %459 = vst.msk [vmem:[%s111_s20] sm:$0xff] %vm458_vm4, %v457_v40 }
 0x5b3 PF: > { %s11_s6 = sadd.s32 1, %s586_s6  }
 0x5b4   : > { %p8_p4 = scmp.ge.s32.totalorder %s11_s6, 4  }
 0x5b6   :  { %10 = sbr.rel (!%p8_p4) target bundleno = 1 (0x1), region = 54 }

// kernel: sasrec_forward.13
= control target key start
LH: loop header
LB: loop body
LE: loop exit
PB: predicated region body
PF: predicated region fallthrough
CT: control target
= control target key end

     0   :  { %vm39_vm0 = vcmask 261120   ;;  %s494_s1 = inlined_call_operand.vmem [shape: f32[32,128], index: 1, kind: input, shape index: {}]   ;;  %s495_s0 = inlined_call_operand.vmem [shape: f32[16,32], index: 0, kind: input, shape index: {}]   ;;  %s496_s3 = inlined_call_operand.vmem [shape: f32[128,32], index: 3, kind: input, shape index: {}]   ;;  %s497_s2 = inlined_call_operand.vmem [shape: f32[1,128], index: 2, kind: input, shape index: {}]   ;;  %s498_s4 = inlined_call_operand.vmem [shape: f32[1,32], index: 4, kind: input, shape index: {}]   ;;  %s499_s5 = inlined_call_operand.vmem [shape: f32[1,32], index: 5, kind: input, shape index: {}]   ;;  %s500_s6 = inlined_call_operand.vmem [shape: f32[1,32], index: 6, kind: input, shape index: {}]   ;;  %s501_s7 = inlined_call_operand.vmem [shape: f32[16,32], index: 7, kind: output, shape index: {}]  }
   0x1   :  { %v31_v0 = vld [vmem:[%s494_s1 + $0x18] sm:$0xff]  ;;  %v30_v1 = vld [vmem:[%s494_s1 + $0x10] sm:$0xff]  ;;  %v403_v2 = vld [vmem:[%s495_s0] sm:$0xff] }
   0x2   :  { %304 = vmatprep.subr.mxu0 %v31_v0  ;;  %v29_v3 = vld [vmem:[%s494_s1 + $0x8] sm:$0xff]  ;;  %312 = vmatprep.mubr.msk.f32.mxu0 %vm39_vm0, %v403_v2  ;;  %v138_v4 = vld [vmem:[%s496_s3 + $0x78] sm:$0xff]  ;;  %v137_v5 = vld [vmem:[%s496_s3 + $0x70] sm:$0xff] }
   0x3   :  { %305 = vmatpush3.msra.mxu0 %v31_v0  ;;  %315 = vmatprep.subr.mxu1 %v138_v4  ;;  %v28_v6 = vld [vmem:[%s494_s1] sm:$0xff]  ;;  %v136_v7 = vld [vmem:[%s496_s3 + $0x68] sm:$0xff]  ;;  %v134_v10 = vld [vmem:[%s496_s3 + $0x58] sm:$0xff] }
   0x4   :  { %306 = vmatprep.subr.mxu0 %v30_v1  ;;  %316 = vmatpush3.msra.mxu1 %v138_v4  ;;  %v425_v8 = vld [vmem:[%s495_s0 + $0x8] sm:$0xff]  ;;  %v135_v9 = vld [vmem:[%s496_s3 + $0x60] sm:$0xff]  ;;  %v133_v11 = vld [vmem:[%s496_s3 + $0x50] sm:$0xff] }
   0x5   :  { %307 = vmatpush3.msra.mxu0 %v30_v1  ;;  %317 = vmatprep.subr.mxu1 %v137_v5  ;;  %v132_v12 = vld [vmem:[%s496_s3 + $0x48] sm:$0xff]  ;;  %v131_v13 = vld [vmem:[%s496_s3 + $0x40] sm:$0xff]  ;;  %v130_v14 = vld [vmem:[%s496_s3 + $0x38] sm:$0xff] }
   0x6   :  { %308 = vmatprep.subr.mxu0 %v29_v3  ;;  %318 = vmatpush3.msra.mxu1 %v137_v5  ;;  %v129_v15 = vld [vmem:[%s496_s3 + $0x30] sm:$0xff]  ;;  %v128_v16 = vld [vmem:[%s496_s3 + $0x28] sm:$0xff]  ;;  %v127_v17 = vld [vmem:[%s496_s3 + $0x20] sm:$0xff] }
   0x7   :  { %309 = vmatpush3.msra.mxu0 %v29_v3  ;;  %319 = vmatprep.subr.mxu1 %v136_v7  ;;  %v126_v18 = vld [vmem:[%s496_s3 + $0x18] sm:$0xff]  ;;  %v125_v19 = vld [vmem:[%s496_s3 + $0x10] sm:$0xff]  ;;  %v124_v20 = vld [vmem:[%s496_s3 + $0x8] sm:$0xff] }
   0x8   :  { %310 = vmatprep.subr.mxu0 %v28_v6  ;;  %320 = vmatpush3.msra.mxu1 %v136_v7  ;;  %v123_v21 = vld [vmem:[%s496_s3] sm:$0xff] }
   0x9   :  { %311 = vmatpush3.msra.mxu0 %v28_v6  ;;  %321 = vmatprep.subr.mxu1 %v135_v9  ;;  %v274_v22 = vld [vmem:[%s497_s2] ss:$0 sm:$0xff] }
   0xa   :  { %313 = vmatmul.mubr.msk.f32.vlgmr.msra.gmra.mxu0 %vm39_vm0, %v425_v8  ;;  %322 = vmatpush3.msra.mxu1 %v135_v9  ;;  %v277_v30 = vld [vmem:[%s498_s4] ss:$0 sm:$0xff] }
   0xb   :  { %323 = vmatprep.subr.mxu1 %v134_v10  ;;  %v278_v55 = vld [vmem:[%s499_s5] ss:$0 sm:$0xff] }
   0xc   :  { %324 = vmatpush3.msra.mxu1 %v134_v10  ;;  %v279_v57 = vld [vmem:[%s500_s6] ss:$0 sm:$0xff] }
   0xd   :  { %325 = vmatprep.subr.mxu1 %v133_v11 }
   0xe   :  { %326 = vmatpush3.msra.mxu1 %v133_v11 }
   0xf   :  { %327 = vmatprep.subr.mxu1 %v132_v12 }
  0x10   :  { %328 = vmatpush3.msra.mxu1 %v132_v12 }
  0x11   :  { %329 = vmatprep.subr.mxu1 %v131_v13 }
  0x12   :  { %330 = vmatpush3.msra.mxu1 %v131_v13 }
  0x13   :  { %331 = vmatprep.subr.mxu1 %v130_v14 }
  0x14   :  { %332 = vmatpush3.msra.mxu1 %v130_v14 }
  0x15   :  { %333 = vmatprep.subr.mxu1 %v129_v15 }
  0x16   :  { %334 = vmatpush3.msra.mxu1 %v129_v15 }
  0x17   :  { %335 = vmatprep.subr.mxu1 %v128_v16 }
  0x18   :  { %336 = vmatpush3.msra.mxu1 %v128_v16 }
  0x19   :  { %337 = vmatprep.subr.mxu1 %v127_v17 }
  0x1a   :  { %338 = vmatpush3.msra.mxu1 %v127_v17 }
  0x1b   :  { %339 = vmatprep.subr.mxu1 %v126_v18 }
  0x1c   :  { %340 = vmatpush3.msra.mxu1 %v126_v18 }
  0x1d   :  { %341 = vmatprep.subr.mxu1 %v125_v19 }
  0x1e   :  { %342 = vmatpush3.msra.mxu1 %v125_v19 }
  0x1f   :  { %343 = vmatprep.subr.mxu1 %v124_v20 }
  0x20   :  { %344 = vmatpush3.msra.mxu1 %v124_v20 }
  0x21   :  { %345 = vmatprep.subr.mxu1 %v123_v21 }
  0x22   :  { %346 = vmatpush3.msra.mxu1 %v123_v21 }
  0xca   :  { %v314_v23 = vpop.f32.mrf.mxu0 }
  0xcb   :  { %v118_v24 = vadd.f32 %v314_v23, %v274_v22 }
  0xcc   :  { %v112_v25 = vpop.f32.mrf.mxu0 }
  0xcd   :  { %v113_v26 = vadd.f32 %v274_v22, %v112_v25  ;;  %v122_v28 = vmax.f32 %v118_v24, 0.0 }
  0xcf   :  { %v121_v27 = vmax.f32 %v113_v26, 0.0 }
  0xd1   :  { %347 = vmatprep.mubr.f32.mxu1 %v121_v27 }
  0xd2   :  { %348 = vmatmul.mubr.f32.vlgmr.msra.gmra.mxu1 %v122_v28 }
 0x192   :  { %v349_v29 = vpop.f32.mrf.mxu1 }
 0x193   :  { %v218_v32 = vadd.f32 %v349_v29, %v277_v30 }
 0x194   :  { %v212_v31 = vpop.f32.mrf.mxu1 }
 0x195   :  { %v213_v33 = vadd.f32 %v277_v30, %v212_v31  ;;  %v222_v36 = vadd.f32 %v218_v32, %v425_v8 }
 0x197   :  { %v221_v34 = vadd.f32 %v213_v33, %v403_v2  ;;  %v228_v37 = vsel %vm39_vm0, %v222_v36, 0.0 }
 0x199   :  { %v225_v35 = vsel %vm39_vm0, %v221_v34, 0.0 }
 0x19a   :  { %226 = vadd.xlane.f32.xlu0 %v225_v35 }
 0x19e   :  { %229 = vadd.xlane.f32.xlu0 %v228_v37 }
 0x223   :  { %v227_v38 = vpop.xlane.xlu0 %226 }
 0x224   :  { %v232_v39 = vmul.f32 0.03125, %v227_v38 }
 0x226   :  { %v234_v40 = vsub.f32 %v221_v34, %v232_v39 }
 0x227   :  { %v230_v41 = vpop.xlane.xlu0 %229 }
 0x228   :  { %v233_v42 = vmul.f32 0.03125, %v230_v41  ;;  %v236_v43 = vmul.f32 %v234_v40, %v234_v40 }
 0x22a   :  { %v235_v44 = vsub.f32 %v222_v36, %v233_v42  ;;  %v238_v45 = vsel %vm39_vm0, %v236_v43, 0.0 }
 0x22b   :  { %239 = vadd.xlane.f32.xlu1 %v238_v45 }
 0x22c   :  { %v237_v46 = vmul.f32 %v235_v44, %v235_v44 }
 0x22e   :  { %v241_v47 = vsel %vm39_vm0, %v237_v46, 0.0 }
 0x22f   :  { %242 = vadd.xlane.f32.xlu1 %v241_v47 }
 0x2b4   :  { %v240_v48 = vpop.xlane.xlu1 %239 }
 0x2b5   :  { %v244_v49 = vmul.f32 0.03125, %v240_v48 }
 0x2b7   :  { %v246_v50 = vadd.f32 1e-05, %v244_v49 }
 0x2b8   :  { %v243_v51 = vpop.xlane.xlu1 %242 }
 0x2b9   :  { %350 = vrsqrt.f32 %v246_v50  ;;  %v245_v52 = vmul.f32 0.03125, %v243_v51 }
 0x2bb   :  { %v247_v53 = vadd.f32 1e-05, %v245_v52 }
 0x2bd   :  { %352 = vrsqrt.f32 %v247_v53 }
 0x2c6   :  { %v351_v54 = vpop.eup %350 }
 0x2c7   :  { %v250_v56 = vmul.f32 %v351_v54, %v234_v40 }
 0x2c9   :  { %v258_v58 = vmul.f32 %v278_v55, %v250_v56 }
 0x2ca   :  { %v353_v59 = vpop.eup %352 }
 0x2cb   :  { %v266_v60 = vadd.f32 %v279_v57, %v258_v58  ;;  %v251_v61 = vmul.f32 %v353_v59, %v235_v44 }
 0x2cd   :  { %268 = vst.msk [vmem:[%s501_s7] sm:$0xff] %vm39_vm0, %v266_v60  ;;  %v259_v62 = vmul.f32 %v278_v55, %v251_v61 }
 0x2cf   :  { %v267_v63 = vadd.f32 %v279_v57, %v259_v62 }
 0x2d1   :  { %269 = vst.msk [vmem:[%s501_s7 + $0x8] sm:$0xff] %vm39_vm0, %v267_v63 }

// kernel: sasrec_forward.17
= control target key start
LH: loop header
LB: loop body
LE: loop exit
PB: predicated region body
PF: predicated region fallthrough
CT: control target
= control target key end

     0   :  { %vm40_vm0 = vcmask 261120   ;;  %s532_s0 = inlined_call_operand.vmem [shape: f32[16,32], index: 0, kind: input, shape index: {}]   ;;  %s533_s1 = inlined_call_operand.vmem [shape: f32[32,128], index: 1, kind: input, shape index: {}]   ;;  %s534_s2 = inlined_call_operand.vmem [shape: f32[1,128], index: 2, kind: input, shape index: {}]   ;;  %s535_s3 = inlined_call_operand.vmem [shape: f32[128,32], index: 3, kind: input, shape index: {}]   ;;  %s536_s4 = inlined_call_operand.vmem [shape: f32[1,32], index: 4, kind: input, shape index: {}]   ;;  %s537_s5 = inlined_call_operand.vmem [shape: f32[1,32], index: 5, kind: input, shape index: {}]   ;;  %s538_s6 = inlined_call_operand.vmem [shape: f32[1,32], index: 6, kind: input, shape index: {}]   ;;  %s539_s7 = inlined_call_operand.hbm [shape: f32[16,32], index: 7, kind: output, shape index: {}]  }
   0x1   :  { %v32_v0 = vld [vmem:[%s533_s1 + $0x18] sm:$0xff]  ;;  %v31_v1 = vld [vmem:[%s533_s1 + $0x10] sm:$0xff]  ;;  %v444_v2 = vld [vmem:[%s532_s0] sm:$0xff] }
   0x2   :  { %317 = vmatprep.subr.mxu0 %v32_v0  ;;  %v30_v3 = vld [vmem:[%s533_s1 + $0x8] sm:$0xff]  ;;  %325 = vmatprep.mubr.msk.f32.mxu0 %vm40_vm0, %v444_v2  ;;  %v139_v4 = vld [vmem:[%s535_s3 + $0x78] sm:$0xff]  ;;  %v138_v5 = vld [vmem:[%s535_s3 + $0x70] sm:$0xff] }
   0x3   :  { %318 = vmatpush3.msra.mxu0 %v32_v0  ;;  %328 = vmatprep.subr.mxu1 %v139_v4  ;;  %v29_v6 = vld [vmem:[%s533_s1] sm:$0xff]  ;;  %v137_v7 = vld [vmem:[%s535_s3 + $0x68] sm:$0xff] }
   0x4   :  { %319 = vmatprep.subr.mxu0 %v31_v1  ;;  %329 = vmatpush3.msra.mxu1 %v139_v4  ;;  %v466_v8 = vld [vmem:[%s532_s0 + $0x8] sm:$0xff]  ;;  %v136_v9 = vld [vmem:[%s535_s3 + $0x60] sm:$0xff] }
   0x5   :  { %320 = vmatpush3.msra.mxu0 %v31_v1  ;;  %330 = vmatprep.subr.mxu1 %v138_v5 }
   0x6   :  { %321 = vmatprep.subr.mxu0 %v30_v3  ;;  %331 = vmatpush3.msra.mxu1 %v138_v5 }
   0x7   :  { %322 = vmatpush3.msra.mxu0 %v30_v3 }
   0x8   :  { %12 = vsyncpa [#allocation3], 0  ;;  %323 = vmatprep.subr.mxu0 %v29_v6  ;;  %332 = vmatprep.subr.mxu1 %v137_v7  ;;  %v135_v10 = vld [vmem:[%s535_s3 + $0x58] sm:$0xff]  ;;  %v134_v11 = vld [vmem:[%s535_s3 + $0x50] sm:$0xff]  ;;  %s392_s23 = smov [#allocation2]  }
   0x9   :  { %324 = vmatpush3.msra.mxu0 %v29_v6  ;;  %333 = vmatpush3.msra.mxu1 %v137_v7  ;;  %v133_v12 = vld [vmem:[%s535_s3 + $0x48] sm:$0xff]  ;;  %v132_v13 = vld [vmem:[%s535_s3 + $0x40] sm:$0xff]  ;;  %v131_v14 = vld [vmem:[%s535_s3 + $0x38] sm:$0xff]  ;;  %s276_s24 = sshll.u32 %s392_s23, 4  ;;  %s277_s24 = int_to_ptr.vmem [resolvable:$true] %s276_s24 }
   0xa   :  { %326 = vmatmul.mubr.msk.f32.vlgmr.msra.gmra.mxu0 %vm40_vm0, %v466_v8  ;;  %334 = vmatprep.subr.mxu1 %v136_v9  ;;  %v130_v15 = vld [vmem:[%s535_s3 + $0x30] sm:$0xff]  ;;  %v129_v16 = vld [vmem:[%s535_s3 + $0x28] sm:$0xff]  ;;  %v128_v17 = vld [vmem:[%s535_s3 + $0x20] sm:$0xff]  ;;  %s370_s25 = scalar_lea.vmem %s277_s24, 256  ;;  %p375_p1 = scmp.lt.s32.totalorder %s277_s24, %s277_s24 }
   0xb   :  { %335 = vmatpush3.msra.mxu1 %v136_v9  ;;  %v127_v18 = vld [vmem:[%s535_s3 + $0x18] sm:$0xff]  ;;  %v126_v19 = vld [vmem:[%s535_s3 + $0x10] sm:$0xff]  ;;  %v125_v20 = vld [vmem:[%s535_s3 + $0x8] sm:$0xff]  ;;  %p371_p0 = scmp.ne.s32.totalorder %s277_s24, %s370_s25  ;;  %p376_p2 = scmp.lt.s32.totalorder %s370_s25, %s370_s25 }
   0xc   :  { %336 = vmatprep.subr.mxu1 %v135_v10  ;;  %v124_v21 = vld [vmem:[%s535_s3] sm:$0xff] }
   0xd   :  { %337 = vmatpush3.msra.mxu1 %v135_v10  ;;  %v287_v22 = vld [vmem:[%s534_s2] ss:$0 sm:$0xff]  ;;  %p377_p3 = por %p376_p2, %p375_p1 }
   0xe   :  { %338 = vmatprep.subr.mxu1 %v134_v11  ;;  %v290_v30 = vld [vmem:[%s536_s4] ss:$0 sm:$0xff] }
   0xf   :  { %339 = vmatpush3.msra.mxu1 %v134_v11  ;;  %v291_v55 = vld [vmem:[%s537_s5] ss:$0 sm:$0xff]  ;;  %p378_p4 = pnand %p377_p3, %p371_p0 }
  0x10   :  { %340 = vmatprep.subr.mxu1 %v133_v12  ;;  %v292_v57 = vld [vmem:[%s538_s6] ss:$0 sm:$0xff] }
  0x11   :  { %341 = vmatpush3.msra.mxu1 %v133_v12 }
  0x12   :  { %342 = vmatprep.subr.mxu1 %v132_v13 }
  0x13   :  { %343 = vmatpush3.msra.mxu1 %v132_v13 }
  0x14   :  { %344 = vmatprep.subr.mxu1 %v131_v14 }
  0x15   :  { %345 = vmatpush3.msra.mxu1 %v131_v14 }
  0x16   :  { %346 = vmatprep.subr.mxu1 %v130_v15 }
  0x17   :  { %347 = vmatpush3.msra.mxu1 %v130_v15 }
  0x18   :  { %348 = vmatprep.subr.mxu1 %v129_v16 }
  0x19   :  { %349 = vmatpush3.msra.mxu1 %v129_v16 }
  0x1a   :  { %350 = vmatprep.subr.mxu1 %v128_v17 }
  0x1b   :  { %351 = vmatpush3.msra.mxu1 %v128_v17 }
  0x1c   :  { %352 = vmatprep.subr.mxu1 %v127_v18 }
  0x1d   :  { %353 = vmatpush3.msra.mxu1 %v127_v18 }
  0x1e   :  { %354 = vmatprep.subr.mxu1 %v126_v19 }
  0x1f   :  { %355 = vmatpush3.msra.mxu1 %v126_v19 }
  0x20   :  { %356 = vmatprep.subr.mxu1 %v125_v20 }
  0x21   :  { %357 = vmatpush3.msra.mxu1 %v125_v20 }
  0x22   :  { %358 = vmatprep.subr.mxu1 %v124_v21 }
  0x23   :  { %359 = vmatpush3.msra.mxu1 %v124_v21 }
  0xca   :  { %v327_v23 = vpop.f32.mrf.mxu0 }
  0xcb   :  { %v119_v24 = vadd.f32 %v327_v23, %v287_v22 }
  0xcc   :  { %v113_v25 = vpop.f32.mrf.mxu0 }
  0xcd   :  { %v114_v26 = vadd.f32 %v287_v22, %v113_v25  ;;  %v123_v28 = vmax.f32 %v119_v24, 0.0 }
  0xcf   :  { %v122_v27 = vmax.f32 %v114_v26, 0.0 }
  0xd1   :  { %360 = vmatprep.mubr.f32.mxu1 %v122_v27 }
  0xd2   :  { %361 = vmatmul.mubr.f32.vlgmr.msra.gmra.mxu1 %v123_v28 }
 0x192   :  { %v362_v29 = vpop.f32.mrf.mxu1 }
 0x193   :  { %v219_v32 = vadd.f32 %v362_v29, %v290_v30 }
 0x194   :  { %v213_v31 = vpop.f32.mrf.mxu1 }
 0x195   :  { %v214_v33 = vadd.f32 %v290_v30, %v213_v31  ;;  %v223_v36 = vadd.f32 %v219_v32, %v466_v8 }
 0x197   :  { %v222_v34 = vadd.f32 %v214_v33, %v444_v2  ;;  %v229_v37 = vsel %vm40_vm0, %v223_v36, 0.0 }
 0x199   :  { %v226_v35 = vsel %vm40_vm0, %v222_v34, 0.0 }
 0x19a   :  { %227 = vadd.xlane.f32.xlu0 %v226_v35 }
 0x19e   :  { %230 = vadd.xlane.f32.xlu0 %v229_v37 }
 0x223   :  { %v228_v38 = vpop.xlane.xlu0 %227 }
 0x224   :  { %v233_v39 = vmul.f32 0.03125, %v228_v38 }
 0x226   :  { %v235_v40 = vsub.f32 %v222_v34, %v233_v39 }
 0x227   :  { %v231_v41 = vpop.xlane.xlu0 %230 }
 0x228   :  { %v234_v42 = vmul.f32 0.03125, %v231_v41  ;;  %v237_v43 = vmul.f32 %v235_v40, %v235_v40 }
 0x22a   :  { %v236_v44 = vsub.f32 %v223_v36, %v234_v42  ;;  %v239_v45 = vsel %vm40_vm0, %v237_v43, 0.0 }
 0x22b   :  { %240 = vadd.xlane.f32.xlu1 %v239_v45 }
 0x22c   :  { %v238_v46 = vmul.f32 %v236_v44, %v236_v44 }
 0x22e   :  { %v242_v47 = vsel %vm40_vm0, %v238_v46, 0.0 }
 0x22f   :  { %243 = vadd.xlane.f32.xlu1 %v242_v47 }
 0x2b4   :  { %v241_v48 = vpop.xlane.xlu1 %240 }
 0x2b5   :  { %v245_v49 = vmul.f32 0.03125, %v241_v48 }
 0x2b7   :  { %v247_v50 = vadd.f32 1e-05, %v245_v49 }
 0x2b8   :  { %v244_v51 = vpop.xlane.xlu1 %243 }
 0x2b9   :  { %366 = vrsqrt.f32 %v247_v50  ;;  %v246_v52 = vmul.f32 0.03125, %v244_v51 }
 0x2bb   :  { %v248_v53 = vadd.f32 1e-05, %v246_v52 }
 0x2bd   :  { %368 = vrsqrt.f32 %v248_v53 }
 0x2c6   :  { %v367_v54 = vpop.eup %366 }
 0x2c7   :  { %v251_v56 = vmul.f32 %v367_v54, %v235_v40 }
 0x2c9   :  { %v259_v58 = vmul.f32 %v291_v55, %v251_v56 }
 0x2ca   :  { %v369_v59 = vpop.eup %368 }
 0x2cb   :  { %v252_v60 = vmul.f32 %v369_v59, %v236_v44  ;;  %v267_v61 = vadd.f32 %v292_v57, %v259_v58 }
 0x2cd   :  { %v260_v62 = vmul.f32 %v291_v55, %v252_v60  ;;  %269 = vst.msk [vmem:[#allocation2] sm:$0xff] %vm40_vm0, %v267_v61 }
 0x2cf   :  { %v268_v63 = vadd.f32 %v292_v57, %v260_v62 }
 0x2d1   :  { %270 = vst.msk [vmem:[#allocation2 + $0x8] sm:$0xff] %vm40_vm0, %v268_v63 }
 0x2d2   :  { %381 = shalt.err (!%p378_p4)
}
 0x2d3   :  { %s393_s5 = smov 128   ;;  %s394_s6 = smov 8  }
 0x2d4   :  { %282 = dma.vmem_to_hbm [thread:$0]  %s277_s24, 256, %s539_s7, [#allocation3], %s393_s5, %s393_s5, %s394_s6  }
 0x2d5   :  { %390 = dma.done.wait [#allocation3], 256  }
 0x2d6   :  { %391 = vsyncadd [#allocation3], 4294967040 }
 0x2d7   :  { %286 = vsyncpa [#allocation3], 1 }

</bundles_post_ra>
